<compile_context>
chip_gen: v7x
topology: tpu7x:2x2x1
jax: 0.10.0
libtpu: 0.0.40
codegen_flags: <defaults>
</compile_context>

<pallas_src>
import functools

import jax
import jax.numpy as jnp
from jax.experimental import pallas as pl
from jax.experimental.pallas import tpu as pltpu


# --------------------------------------------------------------------------- #
# Stage 1: base-resolution guided-filter coefficients A, b  (one frame / step)
# --------------------------------------------------------------------------- #
def _base_kernel(bsrc_ref, bfgr_ref, bpha_ref, bhid_ref, tw_ref, th_ref,
                 w1_ref, t1_ref, w2_ref, t2_ref, w3_ref, b3_ref, ab_ref):
    f32 = jnp.float32
    h, w = bsrc_ref.shape[2], bsrc_ref.shape[3]
    hid = bhid_ref.shape[1]

    bs = bsrc_ref[0].astype(f32)                                    # (3, h, w)
    bx = jnp.concatenate(
        [bs, (bs[0:1] + bs[1:2] + bs[2:3]) * (1.0 / 3.0)], axis=0)  # (4, h, w)
    by = jnp.concatenate(
        [bfgr_ref[0].astype(f32), bpha_ref[0].astype(f32)], axis=0)  # (4, h, w)

    # The 16 channels whose 3x3 box means we need: x, y, x*y, x*x.
    x16 = jnp.concatenate([bx, by, bx * by, bx * bx], axis=0)        # (16, h, w)

    # Separable zero-padded 3x3 box filter (weights 1/9) as MXU matmuls with
    # tridiagonal 1-matrices: horizontal pass batched over all 16*h rows,
    # vertical pass as 16 small (h,h)x(h,w) matmuls (no lane/sublane shuffles).
    xh = jnp.dot(x16.reshape(16 * h, w), tw_ref[...],
                 preferred_element_type=f32).reshape(16, h, w)
    th = th_ref[...]
    boxed = jnp.concatenate(
        [jnp.dot(th, xh[c], preferred_element_type=f32)[None]
         for c in range(16)], axis=0) * (1.0 / 9.0)                  # (16, h, w)

    mean_x, mean_y = boxed[0:4], boxed[4:8]
    cov_xy = boxed[8:12] - mean_x * mean_y
    var_x = boxed[12:16] - mean_x * mean_x

    # 1x1-conv MLP; BatchNorm (eval mode) pre-folded into the weights.
    z = jnp.concatenate([cov_xy, var_x, bhid_ref[0].astype(f32)], axis=0)
    zf = z.reshape(8 + hid, h * w)
    h1 = jnp.maximum(
        jnp.dot(w1_ref[...], zf, preferred_element_type=f32) + t1_ref[...], 0.0)
    h2 = jnp.maximum(
        jnp.dot(w2_ref[...], h1, preferred_element_type=f32) + t2_ref[...], 0.0)
    A = (jnp.dot(w3_ref[...], h2, preferred_element_type=f32)
         + b3_ref[...]).reshape(4, h, w)
    b = mean_y - A * mean_x

    ab_ref[0, 0:4, :, :] = A
    ab_ref[0, 4:8, :, :] = b


# --------------------------------------------------------------------------- #
# Stage 2: row-tiled bilinear upsample fused with out = A * fine_x + b
# --------------------------------------------------------------------------- #
def _fine_kernel(fine_ref, ab_ref, uph_ref, upwT_ref, out_ref, *, mxu_dtype):
    f32 = jnp.float32
    tile_h = uph_ref.shape[0]

    uph = uph_ref[...].astype(mxu_dtype)                             # (T, h)
    # Height upsample for all 8 channels (A0..3, b0..3) of this row tile.
    cols = [jnp.dot(uph, ab_ref[0, c].astype(mxu_dtype),
                    preferred_element_type=f32) for c in range(8)]
    slab = jnp.concatenate(cols, axis=0).astype(mxu_dtype)           # (8T, w)
    # Width upsample: one big lane-dense MXU matmul.
    big = jnp.dot(slab, upwT_ref[...].astype(mxu_dtype),
                  preferred_element_type=f32)                        # (8T, W)

    # Fused epilogue; each fine channel is loaded/cast exactly once.
    f0 = fine_ref[0, 0].astype(f32)
    f1 = fine_ref[0, 1].astype(f32)
    f2 = fine_ref[0, 2].astype(f32)
    fx = (f0, f1, f2, (f0 + f1 + f2) * (1.0 / 3.0))
    for c in range(4):
        a_up = big[c * tile_h:(c + 1) * tile_h]
        b_up = big[(4 + c) * tile_h:(5 + c) * tile_h]
        out_ref[0, c, :, :] = (a_up * fx[c] + b_up).astype(out_ref.dtype)


# --------------------------------------------------------------------------- #
# Glue: interpolation / tridiagonal matrices, BN folding, wrapper
# --------------------------------------------------------------------------- #
def _bilinear_matrix(out_size, in_size):
    # Matches F.interpolate(..., mode='bilinear', align_corners=False) per axis.
    o = jnp.arange(out_size, dtype=jnp.float32)
    src = jnp.maximum((o + 0.5) * (in_size / out_size) - 0.5, 0.0)
    i0 = jnp.minimum(jnp.floor(src).astype(jnp.int32), in_size - 1)
    i1 = jnp.minimum(i0 + 1, in_size - 1)
    lam1 = src - i0.astype(jnp.float32)
    rows = jnp.arange(out_size)
    m = jnp.zeros((out_size, in_size), jnp.float32)
    m = m.at[rows, i0].add(1.0 - lam1)
    m = m.at[rows, i1].add(lam1)
    return m


def _tridiag(n):
    i = jnp.arange(n)
    return (jnp.abs(i[:, None] - i[None, :]) <= 1).astype(jnp.float32)


def _fold_bn(weight, bn, eps=1e-5):
    s = bn["gamma"] * jax.lax.rsqrt(bn["var"] + eps)
    t = bn["beta"] - s * bn["mean"]
    return weight * s[:, None], t[:, None]


def _pick_tile_h(H, target=64):
    if H <= target:
        return H
    for t in range(min(target, H), 0, -1):
        if H % t == 0 and t % 8 == 0:
            return t
    return H


def init_params(key, hid_channels=16):
    ks = jax.random.split(key, 6)
    in_ch = 4 * 2 + hid_channels

    def bn_init(k, c):
        k1, k2, k3, k4 = jax.random.split(k, 4)
        return dict(gamma=1.0 + 0.1 * jax.random.normal(k1, (c,), jnp.float32),
                    beta=0.1 * jax.random.normal(k2, (c,), jnp.float32),
                    mean=0.1 * jax.random.normal(k3, (c,), jnp.float32),
                    var=1.0 + 0.1 * jnp.abs(jax.random.normal(k4, (c,), jnp.float32)))

    return dict(
        w1=0.2 * jax.random.normal(ks[0], (hid_channels, in_ch), jnp.float32),
        w2=0.2 * jax.random.normal(ks[1], (hid_channels, hid_channels), jnp.float32),
        w3=0.2 * jax.random.normal(ks[2], (4, hid_channels), jnp.float32),
        b3=0.1 * jax.random.normal(ks[3], (4,), jnp.float32),
        bn1=bn_init(ks[4], hid_channels),
        bn2=bn_init(ks[5], hid_channels))


def _forward_single(params, fine_src, base_src, base_fgr, base_pha, base_hid,
                    mxu_dtype=jnp.float32, tile_h_target=64):
    B, _, H, W = fine_src.shape
    _, hid, h, w = base_hid.shape

    w1f, t1 = _fold_bn(params["w1"], params["bn1"])
    w2f, t2 = _fold_bn(params["w2"], params["bn2"])
    w3 = params["w3"]
    b3 = params["b3"].reshape(-1, 1)

    tw = _tridiag(w)
    th = _tridiag(h)
    up_h = _bilinear_matrix(H, h)           # (H, h)
    up_wT = _bilinear_matrix(W, w).T        # (w, W)

    frame = lambda C: pl.BlockSpec((1, C, h, w), lambda b: (b, 0, 0, 0))
    full2 = lambda a: pl.BlockSpec(a.shape, lambda b: (0, 0))

    # ---- stage 1: A, b at base resolution --------------------------------- #
    ab = pl.pallas_call(
        _base_kernel,
        out_shape=jax.ShapeDtypeStruct((B, 8, h, w), jnp.float32),
        grid=(B,),
        in_specs=[frame(3), frame(3), frame(1), frame(hid),
                  full2(tw), full2(th),
                  full2(w1f), full2(t1), full2(w2f), full2(t2),
                  full2(w3), full2(b3)],
        out_specs=frame(8),
        compiler_params=pltpu.CompilerParams(
            dimension_semantics=("parallel",),
            vmem_limit_bytes=48 * 1024 * 1024),
    )(base_src, base_fgr, base_pha, base_hid, tw, th, w1f, t1, w2f, t2, w3, b3)

    # ---- stage 2: row-tiled upsample + fused A*x+b ------------------------- #
    TILE_H = _pick_tile_h(H, tile_h_target)
    NT = H // TILE_H
    fine_kernel = functools.partial(_fine_kernel, mxu_dtype=mxu_dtype)

    out = pl.pallas_call(
        fine_kernel,
        out_shape=jax.ShapeDtypeStruct((B, 4, H, W), fine_src.dtype),
        grid=(B, NT),
        in_specs=[pl.BlockSpec((1, 3, TILE_H, W), lambda b, t: (b, 0, t, 0)),
                  pl.BlockSpec((1, 8, h, w), lambda b, t: (b, 0, 0, 0)),
                  pl.BlockSpec((TILE_H, h), lambda b, t: (t, 0)),
                  pl.BlockSpec((w, W), lambda b, t: (0, 0))],
        out_specs=pl.BlockSpec((1, 4, TILE_H, W), lambda b, t: (b, 0, t, 0)),
        compiler_params=pltpu.CompilerParams(
            dimension_semantics=("parallel", "parallel"),
            vmem_limit_bytes=48 * 1024 * 1024),
    )(fine_src, ab, up_h, up_wT)

    return out[:, 0:3], out[:, 3:4]


def deep_guided_filter_refiner(params, fine_src, base_src, base_fgr, base_pha,
                               base_hid, mxu_dtype=jnp.float32):
    if fine_src.ndim == 5:  # time-series: flatten (B, T) -> N, then unflatten
        B, T = fine_src.shape[:2]
        f = lambda x: x.reshape((B * T,) + x.shape[2:])
        fgr, pha = _forward_single(params, f(fine_src), f(base_src), f(base_fgr),
                                   f(base_pha), f(base_hid), mxu_dtype=mxu_dtype)
        return (fgr.reshape((B, T) + fgr.shape[1:]),
                pha.reshape((B, T) + pha.shape[1:]))
    return _forward_single(params, fine_src, base_src, base_fgr, base_pha,
                           base_hid, mxu_dtype=mxu_dtype)


# --------------------------------------------------------------------------- #
# Pure-JAX reference (independent of the Pallas kernels, unfolded BN)
# --------------------------------------------------------------------------- #
def _reference_forward(params, fine_src, base_src, base_fgr, base_pha, base_hid,
                       eps=1e-5):
    def box(x):
        hh, ww = x.shape[2], x.shape[3]
        xp = jnp.pad(x, ((0, 0), (0, 0), (1, 1), (1, 1)))
        s = 0.0
        for di in range(3):
            for dj in range(3):
                s = s + xp[:, :, di:di + hh, dj:dj + ww]
        return s / 9.0

    def bn(x, p):
        s = p["gamma"] * jax.lax.rsqrt(p["var"] + eps)
        t = p["beta"] - s * p["mean"]
        return x * s[None, :, None, None] + t[None, :, None, None]

    conv = lambda wt, x: jnp.einsum('oc,bchw->bohw', wt, x)

    fine_x = jnp.concatenate([fine_src, fine_src.mean(1, keepdims=True)], axis=1)
    base_x = jnp.concatenate([base_src, base_src.mean(1, keepdims=True)], axis=1)
    base_y = jnp.concatenate([base_fgr, base_pha], axis=1)
    mean_x, mean_y = box(base_x), box(base_y)
    cov_xy = box(base_x * base_y) - mean_x * mean_y
    var_x = box(base_x * base_x) - mean_x * mean_x
    z = jnp.concatenate([cov_xy, var_x, base_hid], axis=1)
    h1 = jax.nn.relu(bn(conv(params["w1"], z), params["bn1"]))
    h2 = jax.nn.relu(bn(conv(params["w2"], h1), params["bn2"]))
    A = conv(params["w3"], h2) + params["b3"][None, :, None, None]
    b = mean_y - A * mean_x
    H, W = fine_src.shape[2:]
    h, w = base_src.shape[2:]
    up_h, up_w = _bilinear_matrix(H, h), _bilinear_matrix(W, w)
    A_up = jnp.einsum('Hh,bchw,Ww->bcHW', up_h, A, up_w)
    b_up = jnp.einsum('Hh,bchw,Ww->bcHW', up_h, b, up_w)
    out = A_up * fine_x + b_up
    return out[:, 0:3], out[:, 3:4]


# --------------------------------------------------------------------------- #
# Main
# --------------------------------------------------------------------------- #
if __name__ == "__main__":
    key = jax.random.PRNGKey(0)
    kp, kf, kbs, kbf, kbp, kbh = jax.random.split(key, 6)

    hid = 16
    B, H, W = 2, 16, 16     # fine resolution
    h, w = 8, 8             # base (low) resolution

    params = init_params(kp, hid)
    fine_src = jax.random.uniform(kf, (B, 3, H, W), jnp.float32)
    base_src = jax.random.uniform(kbs, (B, 3, h, w), jnp.float32)
    base_fgr = jax.random.uniform(kbf, (B, 3, h, w), jnp.float32)
    base_pha = jax.random.uniform(kbp, (B, 1, h, w), jnp.float32)
    base_hid = jax.random.uniform(kbh, (B, hid, h, w), jnp.float32)

    refine = jax.jit(deep_guided_filter_refiner, static_argnames=("mxu_dtype",))

    # f32 MXU path vs pure-JAX reference.
    fgr, pha = refine(params, fine_src, base_src, base_fgr, base_pha, base_hid)
    jax.block_until_ready((fgr, pha))
    rfgr, rpha = _reference_forward(params, fine_src, base_src, base_fgr,
                                    base_pha, base_hid)
    assert fgr.shape == (B, 3, H, W) and pha.shape == (B, 1, H, W)
    err = max(float(jnp.max(jnp.abs(fgr - rfgr))),
              float(jnp.max(jnp.abs(pha - rpha))))
    assert err < 2e-2, f"f32 max abs error {err}"

    # bf16-MXU-operand path (f32 accumulation), looser tolerance.
    fgr16, pha16 = refine(params, fine_src, base_src, base_fgr, base_pha,
                          base_hid, mxu_dtype=jnp.bfloat16)
    jax.block_until_ready((fgr16, pha16))
    err16 = max(float(jnp.max(jnp.abs(fgr16 - rfgr))),
                float(jnp.max(jnp.abs(pha16 - rpha))))
    assert err16 < 1e-1, f"bf16 max abs error {err16}"

    # Time-series (5-D) path smoke test.
    tfgr, tpha = refine(params, fine_src[:, None], base_src[:, None],
                        base_fgr[:, None], base_pha[:, None], base_hid[:, None])
    jax.block_until_ready((tfgr, tpha))
    assert tfgr.shape == (B, 1, 3, H, W) and tpha.shape == (B, 1, 1, H, W)
    assert bool(jnp.all(jnp.isfinite(tfgr))) and bool(jnp.all(jnp.isfinite(tpha)))

    print("KERNEL_OK")
</pallas_src>

<mosaic_0001>
module attributes {stable_mosaic.version = 11 : i64} {
  func.func private @main(%arg0: i32) attributes {dimension_semantics = [#tpu.dimension_semantics<core_parallel>], iteration_bounds = array<i64: 2>, tpu.core_type = #tpu.core_type<sc_scalar_subcore>, window_params = []} {
    return
  }
}

module attributes {stable_mosaic.version = 11 : i64} {
  func.func private @main(%arg0: i32) attributes {dimension_semantics = [#tpu.dimension_semantics<core_parallel>], iteration_bounds = array<i64: 2>, tpu.core_type = #tpu.core_type<sc_scalar_subcore>, window_params = []} {
    return
  }
}

module attributes {stable_mosaic.version = 11 : i64} {
  func.func @_base_kernel(%arg0: i32, %arg1: memref<1x3x8x8xf32, #tpu.memory_space<vmem>>, %arg2: memref<1x3x8x8xf32, #tpu.memory_space<vmem>>, %arg3: memref<1x1x8x8xf32, #tpu.memory_space<vmem>>, %arg4: memref<1x16x8x8xf32, #tpu.memory_space<vmem>>, %arg5: memref<8x8xf32, #tpu.memory_space<vmem>>, %arg6: memref<8x8xf32, #tpu.memory_space<vmem>>, %arg7: memref<16x24xf32, #tpu.memory_space<vmem>>, %arg8: memref<16x1xf32, #tpu.memory_space<vmem>>, %arg9: memref<16x16xf32, #tpu.memory_space<vmem>>, %arg10: memref<16x1xf32, #tpu.memory_space<vmem>>, %arg11: memref<4x16xf32, #tpu.memory_space<vmem>>, %arg12: memref<4x1xf32, #tpu.memory_space<vmem>>, %arg13: memref<1x8x8x8xf32, #tpu.memory_space<vmem>>) attributes {dimension_semantics = [#tpu.dimension_semantics<parallel>], iteration_bounds = array<i64: 2>, scalar_prefetch = 0 : i64, scratch_operands = 0 : i64, tpu.core_type = #tpu.core_type<tc>, window_params = [{transform_indices = @transform_0, window_bounds = array<i64: 1, 3, 8, 8>}, {transform_indices = @transform_1, window_bounds = array<i64: 1, 3, 8, 8>}, {transform_indices = @transform_2, window_bounds = array<i64: 1, 1, 8, 8>}, {transform_indices = @transform_3, window_bounds = array<i64: 1, 16, 8, 8>}, {pipeline_mode = #tpu.pipeline_mode<synchronous>, transform_indices = @transform_4, window_bounds = array<i64: 8, 8>}, {pipeline_mode = #tpu.pipeline_mode<synchronous>, transform_indices = @transform_5, window_bounds = array<i64: 8, 8>}, {pipeline_mode = #tpu.pipeline_mode<synchronous>, transform_indices = @transform_6, window_bounds = array<i64: 16, 24>}, {pipeline_mode = #tpu.pipeline_mode<synchronous>, transform_indices = @transform_7, window_bounds = array<i64: 16, 1>}, {pipeline_mode = #tpu.pipeline_mode<synchronous>, transform_indices = @transform_8, window_bounds = array<i64: 16, 16>}, {pipeline_mode = #tpu.pipeline_mode<synchronous>, transform_indices = @transform_9, window_bounds = array<i64: 16, 1>}, {pipeline_mode = #tpu.pipeline_mode<synchronous>, transform_indices = @transform_10, window_bounds = array<i64: 4, 16>}, {pipeline_mode = #tpu.pipeline_mode<synchronous>, transform_indices = @transform_11, window_bounds = array<i64: 4, 1>}, {transform_indices = @transform_12, window_bounds = array<i64: 1, 8, 8, 8>}]} {
    %c0 = arith.constant 0 : index
    %c0_0 = arith.constant 0 : index
    %c0_1 = arith.constant 0 : index
    %c0_2 = arith.constant 0 : index
    %0 = vector.load %arg1[%c0, %c0_0, %c0_1, %c0_2] : memref<1x3x8x8xf32, #tpu.memory_space<vmem>>, vector<1x3x8x8xf32>
    %1 = vector.shape_cast %0 : vector<1x3x8x8xf32> to vector<3x8x8xf32>
    %2 = vector.extract_strided_slice %1 {offsets = [0, 0, 0], sizes = [1, 8, 8], strides = [1, 1, 1]} : vector<3x8x8xf32> to vector<1x8x8xf32>
    %3 = vector.extract_strided_slice %1 {offsets = [1, 0, 0], sizes = [1, 8, 8], strides = [1, 1, 1]} : vector<3x8x8xf32> to vector<1x8x8xf32>
    %4 = arith.addf %2, %3 : vector<1x8x8xf32>
    %5 = vector.extract_strided_slice %1 {offsets = [2, 0, 0], sizes = [1, 8, 8], strides = [1, 1, 1]} : vector<3x8x8xf32> to vector<1x8x8xf32>
    %6 = arith.addf %4, %5 : vector<1x8x8xf32>
    %cst = arith.constant 0.333333343 : f32
    %7 = vector.broadcast %cst : f32 to vector<1x8x8xf32>
    %8 = arith.mulf %6, %7 : vector<1x8x8xf32>
    %9 = tpu.concatenate %1, %8 in 0 : vector<3x8x8xf32>, vector<1x8x8xf32> -> vector<4x8x8xf32>
    %c0_3 = arith.constant 0 : index
    %c0_4 = arith.constant 0 : index
    %c0_5 = arith.constant 0 : index
    %c0_6 = arith.constant 0 : index
    %10 = vector.load %arg2[%c0_3, %c0_4, %c0_5, %c0_6] : memref<1x3x8x8xf32, #tpu.memory_space<vmem>>, vector<1x3x8x8xf32>
    %11 = vector.shape_cast %10 : vector<1x3x8x8xf32> to vector<3x8x8xf32>
    %c0_7 = arith.constant 0 : index
    %c0_8 = arith.constant 0 : index
    %c0_9 = arith.constant 0 : index
    %c0_10 = arith.constant 0 : index
    %12 = vector.load %arg3[%c0_7, %c0_8, %c0_9, %c0_10] : memref<1x1x8x8xf32, #tpu.memory_space<vmem>>, vector<1x1x8x8xf32>
    %13 = vector.shape_cast %12 : vector<1x1x8x8xf32> to vector<1x8x8xf32>
    %14 = tpu.concatenate %11, %13 in 0 : vector<3x8x8xf32>, vector<1x8x8xf32> -> vector<4x8x8xf32>
    %15 = arith.mulf %9, %14 : vector<4x8x8xf32>
    %16 = arith.mulf %9, %9 : vector<4x8x8xf32>
    %17 = tpu.concatenate %9, %14, %15, %16 in 0 : vector<4x8x8xf32>, vector<4x8x8xf32>, vector<4x8x8xf32>, vector<4x8x8xf32> -> vector<16x8x8xf32>
    %18 = vector.shape_cast %17 : vector<16x8x8xf32> to vector<128x8xf32>
    %c0_11 = arith.constant 0 : index
    %c0_12 = arith.constant 0 : index
    %19 = vector.load %arg5[%c0_11, %c0_12] : memref<8x8xf32, #tpu.memory_space<vmem>>, vector<8x8xf32>
    %cst_13 = arith.constant dense<0.000000e+00> : vector<128x8xf32>
    %20 = tpu.matmul %18, %19, %cst_13 {dimension_numbers = #tpu.dot_dimension_numbers<[1], [0], [0], [1], [0, 0, 1, 1], [], []>} : vector<128x8xf32>, vector<8x8xf32>, vector<128x8xf32> -> vector<128x8xf32>
    %21 = vector.shape_cast %20 : vector<128x8xf32> to vector<16x8x8xf32>
    %c0_14 = arith.constant 0 : index
    %c0_15 = arith.constant 0 : index
    %22 = vector.load %arg6[%c0_14, %c0_15] : memref<8x8xf32, #tpu.memory_space<vmem>>, vector<8x8xf32>
    %23 = vector.extract_strided_slice %21 {offsets = [0, 0, 0], sizes = [1, 8, 8], strides = [1, 1, 1]} : vector<16x8x8xf32> to vector<1x8x8xf32>
    %24 = vector.shape_cast %23 : vector<1x8x8xf32> to vector<8x8xf32>
    %cst_16 = arith.constant dense<0.000000e+00> : vector<8x8xf32>
    %25 = tpu.matmul %22, %24, %cst_16 {dimension_numbers = #tpu.dot_dimension_numbers<[1], [0], [0], [1], [0, 0, 1, 1], [], []>} : vector<8x8xf32>, vector<8x8xf32>, vector<8x8xf32> -> vector<8x8xf32>
    %26 = vector.shape_cast %25 : vector<8x8xf32> to vector<1x8x8xf32>
    %27 = vector.extract_strided_slice %21 {offsets = [1, 0, 0], sizes = [1, 8, 8], strides = [1, 1, 1]} : vector<16x8x8xf32> to vector<1x8x8xf32>
    %28 = vector.shape_cast %27 : vector<1x8x8xf32> to vector<8x8xf32>
    %cst_17 = arith.constant dense<0.000000e+00> : vector<8x8xf32>
    %29 = tpu.matmul %22, %28, %cst_17 {dimension_numbers = #tpu.dot_dimension_numbers<[1], [0], [0], [1], [0, 0, 1, 1], [], []>} : vector<8x8xf32>, vector<8x8xf32>, vector<8x8xf32> -> vector<8x8xf32>
    %30 = vector.shape_cast %29 : vector<8x8xf32> to vector<1x8x8xf32>
    %31 = vector.extract_strided_slice %21 {offsets = [2, 0, 0], sizes = [1, 8, 8], strides = [1, 1, 1]} : vector<16x8x8xf32> to vector<1x8x8xf32>
    %32 = vector.shape_cast %31 : vector<1x8x8xf32> to vector<8x8xf32>
    %cst_18 = arith.constant dense<0.000000e+00> : vector<8x8xf32>
    %33 = tpu.matmul %22, %32, %cst_18 {dimension_numbers = #tpu.dot_dimension_numbers<[1], [0], [0], [1], [0, 0, 1, 1], [], []>} : vector<8x8xf32>, vector<8x8xf32>, vector<8x8xf32> -> vector<8x8xf32>
    %34 = vector.shape_cast %33 : vector<8x8xf32> to vector<1x8x8xf32>
    %35 = vector.extract_strided_slice %21 {offsets = [3, 0, 0], sizes = [1, 8, 8], strides = [1, 1, 1]} : vector<16x8x8xf32> to vector<1x8x8xf32>
    %36 = vector.shape_cast %35 : vector<1x8x8xf32> to vector<8x8xf32>
    %cst_19 = arith.constant dense<0.000000e+00> : vector<8x8xf32>
    %37 = tpu.matmul %22, %36, %cst_19 {dimension_numbers = #tpu.dot_dimension_numbers<[1], [0], [0], [1], [0, 0, 1, 1], [], []>} : vector<8x8xf32>, vector<8x8xf32>, vector<8x8xf32> -> vector<8x8xf32>
    %38 = vector.shape_cast %37 : vector<8x8xf32> to vector<1x8x8xf32>
    %39 = vector.extract_strided_slice %21 {offsets = [4, 0, 0], sizes = [1, 8, 8], strides = [1, 1, 1]} : vector<16x8x8xf32> to vector<1x8x8xf32>
    %40 = vector.shape_cast %39 : vector<1x8x8xf32> to vector<8x8xf32>
    %cst_20 = arith.constant dense<0.000000e+00> : vector<8x8xf32>
    %41 = tpu.matmul %22, %40, %cst_20 {dimension_numbers = #tpu.dot_dimension_numbers<[1], [0], [0], [1], [0, 0, 1, 1], [], []>} : vector<8x8xf32>, vector<8x8xf32>, vector<8x8xf32> -> vector<8x8xf32>
    %42 = vector.shape_cast %41 : vector<8x8xf32> to vector<1x8x8xf32>
    %43 = vector.extract_strided_slice %21 {offsets = [5, 0, 0], sizes = [1, 8, 8], strides = [1, 1, 1]} : vector<16x8x8xf32> to vector<1x8x8xf32>
    %44 = vector.shape_cast %43 : vector<1x8x8xf32> to vector<8x8xf32>
    %cst_21 = arith.constant dense<0.000000e+00> : vector<8x8xf32>
    %45 = tpu.matmul %22, %44, %cst_21 {dimension_numbers = #tpu.dot_dimension_numbers<[1], [0], [0], [1], [0, 0, 1, 1], [], []>} : vector<8x8xf32>, vector<8x8xf32>, vector<8x8xf32> -> vector<8x8xf32>
    %46 = vector.shape_cast %45 : vector<8x8xf32> to vector<1x8x8xf32>
    %47 = vector.extract_strided_slice %21 {offsets = [6, 0, 0], sizes = [1, 8, 8], strides = [1, 1, 1]} : vector<16x8x8xf32> to vector<1x8x8xf32>
    %48 = vector.shape_cast %47 : vector<1x8x8xf32> to vector<8x8xf32>
    %cst_22 = arith.constant dense<0.000000e+00> : vector<8x8xf32>
    %49 = tpu.matmul %22, %48, %cst_22 {dimension_numbers = #tpu.dot_dimension_numbers<[1], [0], [0], [1], [0, 0, 1, 1], [], []>} : vector<8x8xf32>, vector<8x8xf32>, vector<8x8xf32> -> vector<8x8xf32>
    %50 = vector.shape_cast %49 : vector<8x8xf32> to vector<1x8x8xf32>
    %51 = vector.extract_strided_slice %21 {offsets = [7, 0, 0], sizes = [1, 8, 8], strides = [1, 1, 1]} : vector<16x8x8xf32> to vector<1x8x8xf32>
    %52 = vector.shape_cast %51 : vector<1x8x8xf32> to vector<8x8xf32>
    %cst_23 = arith.constant dense<0.000000e+00> : vector<8x8xf32>
    %53 = tpu.matmul %22, %52, %cst_23 {dimension_numbers = #tpu.dot_dimension_numbers<[1], [0], [0], [1], [0, 0, 1, 1], [], []>} : vector<8x8xf32>, vector<8x8xf32>, vector<8x8xf32> -> vector<8x8xf32>
    %54 = vector.shape_cast %53 : vector<8x8xf32> to vector<1x8x8xf32>
    %55 = vector.extract_strided_slice %21 {offsets = [8, 0, 0], sizes = [1, 8, 8], strides = [1, 1, 1]} : vector<16x8x8xf32> to vector<1x8x8xf32>
    %56 = vector.shape_cast %55 : vector<1x8x8xf32> to vector<8x8xf32>
    %cst_24 = arith.constant dense<0.000000e+00> : vector<8x8xf32>
    %57 = tpu.matmul %22, %56, %cst_24 {dimension_numbers = #tpu.dot_dimension_numbers<[1], [0], [0], [1], [0, 0, 1, 1], [], []>} : vector<8x8xf32>, vector<8x8xf32>, vector<8x8xf32> -> vector<8x8xf32>
    %58 = vector.shape_cast %57 : vector<8x8xf32> to vector<1x8x8xf32>
    %59 = vector.extract_strided_slice %21 {offsets = [9, 0, 0], sizes = [1, 8, 8], strides = [1, 1, 1]} : vector<16x8x8xf32> to vector<1x8x8xf32>
    %60 = vector.shape_cast %59 : vector<1x8x8xf32> to vector<8x8xf32>
    %cst_25 = arith.constant dense<0.000000e+00> : vector<8x8xf32>
    %61 = tpu.matmul %22, %60, %cst_25 {dimension_numbers = #tpu.dot_dimension_numbers<[1], [0], [0], [1], [0, 0, 1, 1], [], []>} : vector<8x8xf32>, vector<8x8xf32>, vector<8x8xf32> -> vector<8x8xf32>
    %62 = vector.shape_cast %61 : vector<8x8xf32> to vector<1x8x8xf32>
    %63 = vector.extract_strided_slice %21 {offsets = [10, 0, 0], sizes = [1, 8, 8], strides = [1, 1, 1]} : vector<16x8x8xf32> to vector<1x8x8xf32>
    %64 = vector.shape_cast %63 : vector<1x8x8xf32> to vector<8x8xf32>
    %cst_26 = arith.constant dense<0.000000e+00> : vector<8x8xf32>
    %65 = tpu.matmul %22, %64, %cst_26 {dimension_numbers = #tpu.dot_dimension_numbers<[1], [0], [0], [1], [0, 0, 1, 1], [], []>} : vector<8x8xf32>, vector<8x8xf32>, vector<8x8xf32> -> vector<8x8xf32>
    %66 = vector.shape_cast %65 : vector<8x8xf32> to vector<1x8x8xf32>
    %67 = vector.extract_strided_slice %21 {offsets = [11, 0, 0], sizes = [1, 8, 8], strides = [1, 1, 1]} : vector<16x8x8xf32> to vector<1x8x8xf32>
    %68 = vector.shape_cast %67 : vector<1x8x8xf32> to vector<8x8xf32>
    %cst_27 = arith.constant dense<0.000000e+00> : vector<8x8xf32>
    %69 = tpu.matmul %22, %68, %cst_27 {dimension_numbers = #tpu.dot_dimension_numbers<[1], [0], [0], [1], [0, 0, 1, 1], [], []>} : vector<8x8xf32>, vector<8x8xf32>, vector<8x8xf32> -> vector<8x8xf32>
    %70 = vector.shape_cast %69 : vector<8x8xf32> to vector<1x8x8xf32>
    %71 = vector.extract_strided_slice %21 {offsets = [12, 0, 0], sizes = [1, 8, 8], strides = [1, 1, 1]} : vector<16x8x8xf32> to vector<1x8x8xf32>
    %72 = vector.shape_cast %71 : vector<1x8x8xf32> to vector<8x8xf32>
    %cst_28 = arith.constant dense<0.000000e+00> : vector<8x8xf32>
    %73 = tpu.matmul %22, %72, %cst_28 {dimension_numbers = #tpu.dot_dimension_numbers<[1], [0], [0], [1], [0, 0, 1, 1], [], []>} : vector<8x8xf32>, vector<8x8xf32>, vector<8x8xf32> -> vector<8x8xf32>
    %74 = vector.shape_cast %73 : vector<8x8xf32> to vector<1x8x8xf32>
    %75 = vector.extract_strided_slice %21 {offsets = [13, 0, 0], sizes = [1, 8, 8], strides = [1, 1, 1]} : vector<16x8x8xf32> to vector<1x8x8xf32>
    %76 = vector.shape_cast %75 : vector<1x8x8xf32> to vector<8x8xf32>
    %cst_29 = arith.constant dense<0.000000e+00> : vector<8x8xf32>
    %77 = tpu.matmul %22, %76, %cst_29 {dimension_numbers = #tpu.dot_dimension_numbers<[1], [0], [0], [1], [0, 0, 1, 1], [], []>} : vector<8x8xf32>, vector<8x8xf32>, vector<8x8xf32> -> vector<8x8xf32>
    %78 = vector.shape_cast %77 : vector<8x8xf32> to vector<1x8x8xf32>
    %79 = vector.extract_strided_slice %21 {offsets = [14, 0, 0], sizes = [1, 8, 8], strides = [1, 1, 1]} : vector<16x8x8xf32> to vector<1x8x8xf32>
    %80 = vector.shape_cast %79 : vector<1x8x8xf32> to vector<8x8xf32>
    %cst_30 = arith.constant dense<0.000000e+00> : vector<8x8xf32>
    %81 = tpu.matmul %22, %80, %cst_30 {dimension_numbers = #tpu.dot_dimension_numbers<[1], [0], [0], [1], [0, 0, 1, 1], [], []>} : vector<8x8xf32>, vector<8x8xf32>, vector<8x8xf32> -> vector<8x8xf32>
    %82 = vector.shape_cast %81 : vector<8x8xf32> to vector<1x8x8xf32>
    %83 = vector.extract_strided_slice %21 {offsets = [15, 0, 0], sizes = [1, 8, 8], strides = [1, 1, 1]} : vector<16x8x8xf32> to vector<1x8x8xf32>
    %84 = vector.shape_cast %83 : vector<1x8x8xf32> to vector<8x8xf32>
    %cst_31 = arith.constant dense<0.000000e+00> : vector<8x8xf32>
    %85 = tpu.matmul %22, %84, %cst_31 {dimension_numbers = #tpu.dot_dimension_numbers<[1], [0], [0], [1], [0, 0, 1, 1], [], []>} : vector<8x8xf32>, vector<8x8xf32>, vector<8x8xf32> -> vector<8x8xf32>
    %86 = vector.shape_cast %85 : vector<8x8xf32> to vector<1x8x8xf32>
    %87 = tpu.concatenate %26, %30, %34, %38, %42, %46, %50, %54, %58, %62, %66, %70, %74, %78, %82, %86 in 0 : vector<1x8x8xf32>, vector<1x8x8xf32>, vector<1x8x8xf32>, vector<1x8x8xf32>, vector<1x8x8xf32>, vector<1x8x8xf32>, vector<1x8x8xf32>, vector<1x8x8xf32>, vector<1x8x8xf32>, vector<1x8x8xf32>, vector<1x8x8xf32>, vector<1x8x8xf32>, vector<1x8x8xf32>, vector<1x8x8xf32>, vector<1x8x8xf32>, vector<1x8x8xf32> -> vector<16x8x8xf32>
    %cst_32 = arith.constant 0.111111112 : f32
    %88 = vector.broadcast %cst_32 : f32 to vector<16x8x8xf32>
    %89 = arith.mulf %87, %88 : vector<16x8x8xf32>
    %90 = vector.extract_strided_slice %89 {offsets = [0, 0, 0], sizes = [4, 8, 8], strides = [1, 1, 1]} : vector<16x8x8xf32> to vector<4x8x8xf32>
    %91 = vector.extract_strided_slice %89 {offsets = [4, 0, 0], sizes = [4, 8, 8], strides = [1, 1, 1]} : vector<16x8x8xf32> to vector<4x8x8xf32>
    %92 = vector.extract_strided_slice %89 {offsets = [8, 0, 0], sizes = [4, 8, 8], strides = [1, 1, 1]} : vector<16x8x8xf32> to vector<4x8x8xf32>
    %93 = arith.mulf %90, %91 : vector<4x8x8xf32>
    %94 = arith.subf %92, %93 : vector<4x8x8xf32>
    %95 = vector.extract_strided_slice %89 {offsets = [12, 0, 0], sizes = [4, 8, 8], strides = [1, 1, 1]} : vector<16x8x8xf32> to vector<4x8x8xf32>
    %96 = arith.mulf %90, %90 : vector<4x8x8xf32>
    %97 = arith.subf %95, %96 : vector<4x8x8xf32>
    %c0_33 = arith.constant 0 : index
    %c0_34 = arith.constant 0 : index
    %c0_35 = arith.constant 0 : index
    %c0_36 = arith.constant 0 : index
    %98 = vector.load %arg4[%c0_33, %c0_34, %c0_35, %c0_36] : memref<1x16x8x8xf32, #tpu.memory_space<vmem>>, vector<1x16x8x8xf32>
    %99 = vector.shape_cast %98 : vector<1x16x8x8xf32> to vector<16x8x8xf32>
    %100 = tpu.concatenate %94, %97, %99 in 0 : vector<4x8x8xf32>, vector<4x8x8xf32>, vector<16x8x8xf32> -> vector<24x8x8xf32>
    %101 = vector.shape_cast %100 : vector<24x8x8xf32> to vector<24x64xf32>
    %c0_37 = arith.constant 0 : index
    %c0_38 = arith.constant 0 : index
    %102 = vector.load %arg7[%c0_37, %c0_38] : memref<16x24xf32, #tpu.memory_space<vmem>>, vector<16x24xf32>
    %cst_39 = arith.constant dense<0.000000e+00> : vector<16x64xf32>
    %103 = tpu.matmul %102, %101, %cst_39 {dimension_numbers = #tpu.dot_dimension_numbers<[1], [0], [0], [1], [0, 0, 1, 1], [], []>} : vector<16x24xf32>, vector<24x64xf32>, vector<16x64xf32> -> vector<16x64xf32>
    %c0_40 = arith.constant 0 : index
    %c0_41 = arith.constant 0 : index
    %104 = vector.load %arg8[%c0_40, %c0_41] : memref<16x1xf32, #tpu.memory_space<vmem>>, vector<16x1xf32>
    %105 = vector.broadcast %104 : vector<16x1xf32> to vector<16x64xf32>
    %106 = arith.addf %103, %105 : vector<16x64xf32>
    %cst_42 = arith.constant 0.000000e+00 : f32
    %107 = vector.broadcast %cst_42 : f32 to vector<16x64xf32>
    %108 = arith.maximumf %106, %107 : vector<16x64xf32>
    %c0_43 = arith.constant 0 : index
    %c0_44 = arith.constant 0 : index
    %109 = vector.load %arg9[%c0_43, %c0_44] : memref<16x16xf32, #tpu.memory_space<vmem>>, vector<16x16xf32>
    %cst_45 = arith.constant dense<0.000000e+00> : vector<16x64xf32>
    %110 = tpu.matmul %109, %108, %cst_45 {dimension_numbers = #tpu.dot_dimension_numbers<[1], [0], [0], [1], [0, 0, 1, 1], [], []>} : vector<16x16xf32>, vector<16x64xf32>, vector<16x64xf32> -> vector<16x64xf32>
    %c0_46 = arith.constant 0 : index
    %c0_47 = arith.constant 0 : index
    %111 = vector.load %arg10[%c0_46, %c0_47] : memref<16x1xf32, #tpu.memory_space<vmem>>, vector<16x1xf32>
    %112 = vector.broadcast %111 : vector<16x1xf32> to vector<16x64xf32>
    %113 = arith.addf %110, %112 : vector<16x64xf32>
    %cst_48 = arith.constant 0.000000e+00 : f32
    %114 = vector.broadcast %cst_48 : f32 to vector<16x64xf32>
    %115 = arith.maximumf %113, %114 : vector<16x64xf32>
    %c0_49 = arith.constant 0 : index
    %c0_50 = arith.constant 0 : index
    %116 = vector.load %arg11[%c0_49, %c0_50] : memref<4x16xf32, #tpu.memory_space<vmem>>, vector<4x16xf32>
    %cst_51 = arith.constant dense<0.000000e+00> : vector<4x64xf32>
    %117 = tpu.matmul %116, %115, %cst_51 {dimension_numbers = #tpu.dot_dimension_numbers<[1], [0], [0], [1], [0, 0, 1, 1], [], []>} : vector<4x16xf32>, vector<16x64xf32>, vector<4x64xf32> -> vector<4x64xf32>
    %c0_52 = arith.constant 0 : index
    %c0_53 = arith.constant 0 : index
    %118 = vector.load %arg12[%c0_52, %c0_53] : memref<4x1xf32, #tpu.memory_space<vmem>>, vector<4x1xf32>
    %119 = vector.broadcast %118 : vector<4x1xf32> to vector<4x64xf32>
    %120 = arith.addf %117, %119 : vector<4x64xf32>
    %121 = vector.shape_cast %120 : vector<4x64xf32> to vector<4x8x8xf32>
    %122 = arith.mulf %121, %90 : vector<4x8x8xf32>
    %123 = arith.subf %91, %122 : vector<4x8x8xf32>
    %c0_54 = arith.constant 0 : index
    %c0_55 = arith.constant 0 : index
    %c0_56 = arith.constant 0 : index
    %c0_57 = arith.constant 0 : index
    %124 = vector.load %arg13[%c0_54, %c0_55, %c0_56, %c0_57] : memref<1x8x8x8xf32, #tpu.memory_space<vmem>>, vector<1x4x8x8xf32>
    %125 = vector.shape_cast %124 : vector<1x4x8x8xf32> to vector<4x8x8xf32>
    %126 = vector.shape_cast %121 : vector<4x8x8xf32> to vector<1x4x8x8xf32>
    tpu.vector_store %arg13[%c0_54, %c0_55, %c0_56, %c0_57], %126 {strides = array<i32>} : memref<1x8x8x8xf32, #tpu.memory_space<vmem>>, vector<1x4x8x8xf32>,
    %c0_58 = arith.constant 0 : index
    %c4 = arith.constant 4 : index
    %c0_59 = arith.constant 0 : index
    %c0_60 = arith.constant 0 : index
    %127 = vector.load %arg13[%c0_58, %c4, %c0_59, %c0_60] : memref<1x8x8x8xf32, #tpu.memory_space<vmem>>, vector<1x4x8x8xf32>
    %128 = vector.shape_cast %127 : vector<1x4x8x8xf32> to vector<4x8x8xf32>
    %129 = vector.shape_cast %123 : vector<4x8x8xf32> to vector<1x4x8x8xf32>
    tpu.vector_store %arg13[%c0_58, %c4, %c0_59, %c0_60], %129 {strides = array<i32>} : memref<1x8x8x8xf32, #tpu.memory_space<vmem>>, vector<1x4x8x8xf32>,
    return
  }
  func.func @transform_0(%arg0: i32) -> (i32, i32, i32, i32) {
    %c0_i32 = arith.constant 0 : i32
    %c0_i32_0 = arith.constant 0 : i32
    %c0_i32_1 = arith.constant 0 : i32
    %c0_i32_2 = arith.constant 0 : i32
    return %arg0, %c0_i32, %c0_i32_0, %c0_i32_1 : i32, i32, i32, i32
  }
  func.func @transform_1(%arg0: i32) -> (i32, i32, i32, i32) {
    %c0_i32 = arith.constant 0 : i32
    %c0_i32_0 = arith.constant 0 : i32
    %c0_i32_1 = arith.constant 0 : i32
    %c0_i32_2 = arith.constant 0 : i32
    return %arg0, %c0_i32, %c0_i32_0, %c0_i32_1 : i32, i32, i32, i32
  }
  func.func @transform_2(%arg0: i32) -> (i32, i32, i32, i32) {
    %c0_i32 = arith.constant 0 : i32
    %c0_i32_0 = arith.constant 0 : i32
    %c0_i32_1 = arith.constant 0 : i32
    %c0_i32_2 = arith.constant 0 : i32
    return %arg0, %c0_i32, %c0_i32_0, %c0_i32_1 : i32, i32, i32, i32
  }
  func.func @transform_3(%arg0: i32) -> (i32, i32, i32, i32) {
    %c0_i32 = arith.constant 0 : i32
    %c0_i32_0 = arith.constant 0 : i32
    %c0_i32_1 = arith.constant 0 : i32
    %c0_i32_2 = arith.constant 0 : i32
    return %arg0, %c0_i32, %c0_i32_0, %c0_i32_1 : i32, i32, i32, i32
  }
  func.func @transform_4(%arg0: i32) -> (i32, i32) {
    %c0_i32 = arith.constant 0 : i32
    %c0_i32_0 = arith.constant 0 : i32
    %c0_i32_1 = arith.constant 0 : i32
    return %c0_i32, %c0_i32_0 : i32, i32
  }
  func.func @transform_5(%arg0: i32) -> (i32, i32) {
    %c0_i32 = arith.constant 0 : i32
    %c0_i32_0 = arith.constant 0 : i32
    %c0_i32_1 = arith.constant 0 : i32
    return %c0_i32, %c0_i32_0 : i32, i32
  }
  func.func @transform_6(%arg0: i32) -> (i32, i32) {
    %c0_i32 = arith.constant 0 : i32
    %c0_i32_0 = arith.constant 0 : i32
    %c0_i32_1 = arith.constant 0 : i32
    return %c0_i32, %c0_i32_0 : i32, i32
  }
  func.func @transform_7(%arg0: i32) -> (i32, i32) {
    %c0_i32 = arith.constant 0 : i32
    %c0_i32_0 = arith.constant 0 : i32
    %c0_i32_1 = arith.constant 0 : i32
    return %c0_i32, %c0_i32_0 : i32, i32
  }
  func.func @transform_8(%arg0: i32) -> (i32, i32) {
    %c0_i32 = arith.constant 0 : i32
    %c0_i32_0 = arith.constant 0 : i32
    %c0_i32_1 = arith.constant 0 : i32
    return %c0_i32, %c0_i32_0 : i32, i32
  }
  func.func @transform_9(%arg0: i32) -> (i32, i32) {
    %c0_i32 = arith.constant 0 : i32
    %c0_i32_0 = arith.constant 0 : i32
    %c0_i32_1 = arith.constant 0 : i32
    return %c0_i32, %c0_i32_0 : i32, i32
  }
  func.func @transform_10(%arg0: i32) -> (i32, i32) {
    %c0_i32 = arith.constant 0 : i32
    %c0_i32_0 = arith.constant 0 : i32
    %c0_i32_1 = arith.constant 0 : i32
    return %c0_i32, %c0_i32_0 : i32, i32
  }
  func.func @transform_11(%arg0: i32) -> (i32, i32) {
    %c0_i32 = arith.constant 0 : i32
    %c0_i32_0 = arith.constant 0 : i32
    %c0_i32_1 = arith.constant 0 : i32
    return %c0_i32, %c0_i32_0 : i32, i32
  }
  func.func @transform_12(%arg0: i32) -> (i32, i32, i32, i32) {
    %c0_i32 = arith.constant 0 : i32
    %c0_i32_0 = arith.constant 0 : i32
    %c0_i32_1 = arith.constant 0 : i32
    %c0_i32_2 = arith.constant 0 : i32
    return %arg0, %c0_i32, %c0_i32_0, %c0_i32_1 : i32, i32, i32, i32
  }
}

module attributes {stable_mosaic.version = 11 : i64} {
  func.func @_fine_kernel(%arg0: i32, %arg1: i32, %arg2: memref<1x3x16x16xf32, #tpu.memory_space<vmem>>, %arg3: memref<1x8x8x8xf32, #tpu.memory_space<vmem>>, %arg4: memref<16x8xf32, #tpu.memory_space<vmem>>, %arg5: memref<8x16xf32, #tpu.memory_space<vmem>>, %arg6: memref<1x4x16x16xf32, #tpu.memory_space<vmem>>) attributes {dimension_semantics = [#tpu.dimension_semantics<parallel>, #tpu.dimension_semantics<parallel>], iteration_bounds = array<i64: 2, 1>, scalar_prefetch = 0 : i64, scratch_operands = 0 : i64, tpu.core_type = #tpu.core_type<tc>, window_params = [{transform_indices = @transform_0, window_bounds = array<i64: 1, 3, 16, 16>}, {transform_indices = @transform_1, window_bounds = array<i64: 1, 8, 8, 8>}, {transform_indices = @transform_2, window_bounds = array<i64: 16, 8>}, {pipeline_mode = #tpu.pipeline_mode<synchronous>, transform_indices = @transform_3, window_bounds = array<i64: 8, 16>}, {transform_indices = @transform_4, window_bounds = array<i64: 1, 4, 16, 16>}]} {
    %c0 = arith.constant 0 : index
    %c0_0 = arith.constant 0 : index
    %0 = vector.load %arg4[%c0, %c0_0] : memref<16x8xf32, #tpu.memory_space<vmem>>, vector<16x8xf32>
    %c0_1 = arith.constant 0 : index
    %c0_2 = arith.constant 0 : index
    %c0_3 = arith.constant 0 : index
    %c0_4 = arith.constant 0 : index
    %1 = vector.load %arg3[%c0_1, %c0_2, %c0_3, %c0_4] : memref<1x8x8x8xf32, #tpu.memory_space<vmem>>, vector<1x1x8x8xf32>
    %2 = vector.shape_cast %1 : vector<1x1x8x8xf32> to vector<8x8xf32>
    %cst = arith.constant dense<0.000000e+00> : vector<16x8xf32>
    %3 = tpu.matmul %0, %2, %cst {dimension_numbers = #tpu.dot_dimension_numbers<[1], [0], [0], [1], [0, 0, 1, 1], [], []>} : vector<16x8xf32>, vector<8x8xf32>, vector<16x8xf32> -> vector<16x8xf32>
    %c0_5 = arith.constant 0 : index
    %c1 = arith.constant 1 : index
    %c0_6 = arith.constant 0 : index
    %c0_7 = arith.constant 0 : index
    %4 = vector.load %arg3[%c0_5, %c1, %c0_6, %c0_7] : memref<1x8x8x8xf32, #tpu.memory_space<vmem>>, vector<1x1x8x8xf32>
    %5 = vector.shape_cast %4 : vector<1x1x8x8xf32> to vector<8x8xf32>
    %cst_8 = arith.constant dense<0.000000e+00> : vector<16x8xf32>
    %6 = tpu.matmul %0, %5, %cst_8 {dimension_numbers = #tpu.dot_dimension_numbers<[1], [0], [0], [1], [0, 0, 1, 1], [], []>} : vector<16x8xf32>, vector<8x8xf32>, vector<16x8xf32> -> vector<16x8xf32>
    %c0_9 = arith.constant 0 : index
    %c2 = arith.constant 2 : index
    %c0_10 = arith.constant 0 : index
    %c0_11 = arith.constant 0 : index
    %7 = vector.load %arg3[%c0_9, %c2, %c0_10, %c0_11] : memref<1x8x8x8xf32, #tpu.memory_space<vmem>>, vector<1x1x8x8xf32>
    %8 = vector.shape_cast %7 : vector<1x1x8x8xf32> to vector<8x8xf32>
    %cst_12 = arith.constant dense<0.000000e+00> : vector<16x8xf32>
    %9 = tpu.matmul %0, %8, %cst_12 {dimension_numbers = #tpu.dot_dimension_numbers<[1], [0], [0], [1], [0, 0, 1, 1], [], []>} : vector<16x8xf32>, vector<8x8xf32>, vector<16x8xf32> -> vector<16x8xf32>
    %c0_13 = arith.constant 0 : index
    %c3 = arith.constant 3 : index
    %c0_14 = arith.constant 0 : index
    %c0_15 = arith.constant 0 : index
    %10 = vector.load %arg3[%c0_13, %c3, %c0_14, %c0_15] : memref<1x8x8x8xf32, #tpu.memory_space<vmem>>, vector<1x1x8x8xf32>
    %11 = vector.shape_cast %10 : vector<1x1x8x8xf32> to vector<8x8xf32>
    %cst_16 = arith.constant dense<0.000000e+00> : vector<16x8xf32>
    %12 = tpu.matmul %0, %11, %cst_16 {dimension_numbers = #tpu.dot_dimension_numbers<[1], [0], [0], [1], [0, 0, 1, 1], [], []>} : vector<16x8xf32>, vector<8x8xf32>, vector<16x8xf32> -> vector<16x8xf32>
    %c0_17 = arith.constant 0 : index
    %c4 = arith.constant 4 : index
    %c0_18 = arith.constant 0 : index
    %c0_19 = arith.constant 0 : index
    %13 = vector.load %arg3[%c0_17, %c4, %c0_18, %c0_19] : memref<1x8x8x8xf32, #tpu.memory_space<vmem>>, vector<1x1x8x8xf32>
    %14 = vector.shape_cast %13 : vector<1x1x8x8xf32> to vector<8x8xf32>
    %cst_20 = arith.constant dense<0.000000e+00> : vector<16x8xf32>
    %15 = tpu.matmul %0, %14, %cst_20 {dimension_numbers = #tpu.dot_dimension_numbers<[1], [0], [0], [1], [0, 0, 1, 1], [], []>} : vector<16x8xf32>, vector<8x8xf32>, vector<16x8xf32> -> vector<16x8xf32>
    %c0_21 = arith.constant 0 : index
    %c5 = arith.constant 5 : index
    %c0_22 = arith.constant 0 : index
    %c0_23 = arith.constant 0 : index
    %16 = vector.load %arg3[%c0_21, %c5, %c0_22, %c0_23] : memref<1x8x8x8xf32, #tpu.memory_space<vmem>>, vector<1x1x8x8xf32>
    %17 = vector.shape_cast %16 : vector<1x1x8x8xf32> to vector<8x8xf32>
    %cst_24 = arith.constant dense<0.000000e+00> : vector<16x8xf32>
    %18 = tpu.matmul %0, %17, %cst_24 {dimension_numbers = #tpu.dot_dimension_numbers<[1], [0], [0], [1], [0, 0, 1, 1], [], []>} : vector<16x8xf32>, vector<8x8xf32>, vector<16x8xf32> -> vector<16x8xf32>
    %c0_25 = arith.constant 0 : index
    %c6 = arith.constant 6 : index
    %c0_26 = arith.constant 0 : index
    %c0_27 = arith.constant 0 : index
    %19 = vector.load %arg3[%c0_25, %c6, %c0_26, %c0_27] : memref<1x8x8x8xf32, #tpu.memory_space<vmem>>, vector<1x1x8x8xf32>
    %20 = vector.shape_cast %19 : vector<1x1x8x8xf32> to vector<8x8xf32>
    %cst_28 = arith.constant dense<0.000000e+00> : vector<16x8xf32>
    %21 = tpu.matmul %0, %20, %cst_28 {dimension_numbers = #tpu.dot_dimension_numbers<[1], [0], [0], [1], [0, 0, 1, 1], [], []>} : vector<16x8xf32>, vector<8x8xf32>, vector<16x8xf32> -> vector<16x8xf32>
    %c0_29 = arith.constant 0 : index
    %c7 = arith.constant 7 : index
    %c0_30 = arith.constant 0 : index
    %c0_31 = arith.constant 0 : index
    %22 = vector.load %arg3[%c0_29, %c7, %c0_30, %c0_31] : memref<1x8x8x8xf32, #tpu.memory_space<vmem>>, vector<1x1x8x8xf32>
    %23 = vector.shape_cast %22 : vector<1x1x8x8xf32> to vector<8x8xf32>
    %cst_32 = arith.constant dense<0.000000e+00> : vector<16x8xf32>
    %24 = tpu.matmul %0, %23, %cst_32 {dimension_numbers = #tpu.dot_dimension_numbers<[1], [0], [0], [1], [0, 0, 1, 1], [], []>} : vector<16x8xf32>, vector<8x8xf32>, vector<16x8xf32> -> vector<16x8xf32>
    %25 = tpu.concatenate %3, %6, %9, %12, %15, %18, %21, %24 in 0 : vector<16x8xf32>, vector<16x8xf32>, vector<16x8xf32>, vector<16x8xf32>, vector<16x8xf32>, vector<16x8xf32>, vector<16x8xf32>, vector<16x8xf32> -> vector<128x8xf32>
    %c0_33 = arith.constant 0 : index
    %c0_34 = arith.constant 0 : index
    %26 = vector.load %arg5[%c0_33, %c0_34] : memref<8x16xf32, #tpu.memory_space<vmem>>, vector<8x16xf32>
    %cst_35 = arith.constant dense<0.000000e+00> : vector<128x16xf32>
    %27 = tpu.matmul %25, %26, %cst_35 {dimension_numbers = #tpu.dot_dimension_numbers<[1], [0], [0], [1], [0, 0, 1, 1], [], []>} : vector<128x8xf32>, vector<8x16xf32>, vector<128x16xf32> -> vector<128x16xf32>
    %c0_36 = arith.constant 0 : index
    %c0_37 = arith.constant 0 : index
    %c0_38 = arith.constant 0 : index
    %c0_39 = arith.constant 0 : index
    %28 = vector.load %arg2[%c0_36, %c0_37, %c0_38, %c0_39] : memref<1x3x16x16xf32, #tpu.memory_space<vmem>>, vector<1x1x16x16xf32>
    %29 = vector.shape_cast %28 : vector<1x1x16x16xf32> to vector<16x16xf32>
    %c0_40 = arith.constant 0 : index
    %c1_41 = arith.constant 1 : index
    %c0_42 = arith.constant 0 : index
    %c0_43 = arith.constant 0 : index
    %30 = vector.load %arg2[%c0_40, %c1_41, %c0_42, %c0_43] : memref<1x3x16x16xf32, #tpu.memory_space<vmem>>, vector<1x1x16x16xf32>
    %31 = vector.shape_cast %30 : vector<1x1x16x16xf32> to vector<16x16xf32>
    %c0_44 = arith.constant 0 : index
    %c2_45 = arith.constant 2 : index
    %c0_46 = arith.constant 0 : index
    %c0_47 = arith.constant 0 : index
    %32 = vector.load %arg2[%c0_44, %c2_45, %c0_46, %c0_47] : memref<1x3x16x16xf32, #tpu.memory_space<vmem>>, vector<1x1x16x16xf32>
    %33 = vector.shape_cast %32 : vector<1x1x16x16xf32> to vector<16x16xf32>
    %34 = arith.addf %29, %31 : vector<16x16xf32>
    %35 = arith.addf %34, %33 : vector<16x16xf32>
    %cst_48 = arith.constant 0.333333343 : f32
    %36 = vector.broadcast %cst_48 : f32 to vector<16x16xf32>
    %37 = arith.mulf %35, %36 : vector<16x16xf32>
    %38 = vector.extract_strided_slice %27 {offsets = [0, 0], sizes = [16, 16], strides = [1, 1]} : vector<128x16xf32> to vector<16x16xf32>
    %39 = vector.extract_strided_slice %27 {offsets = [64, 0], sizes = [16, 16], strides = [1, 1]} : vector<128x16xf32> to vector<16x16xf32>
    %40 = arith.mulf %38, %29 : vector<16x16xf32>
    %41 = arith.addf %40, %39 : vector<16x16xf32>
    %c0_49 = arith.constant 0 : index
    %c0_50 = arith.constant 0 : index
    %c0_51 = arith.constant 0 : index
    %c0_52 = arith.constant 0 : index
    %42 = vector.load %arg6[%c0_49, %c0_50, %c0_51, %c0_52] : memref<1x4x16x16xf32, #tpu.memory_space<vmem>>, vector<1x1x16x16xf32>
    %43 = vector.shape_cast %42 : vector<1x1x16x16xf32> to vector<16x16xf32>
    %44 = vector.shape_cast %41 : vector<16x16xf32> to vector<1x1x16x16xf32>
    tpu.vector_store %arg6[%c0_49, %c0_50, %c0_51, %c0_52], %44 {strides = array<i32>} : memref<1x4x16x16xf32, #tpu.memory_space<vmem>>, vector<1x1x16x16xf32>,
    %45 = vector.extract_strided_slice %27 {offsets = [16, 0], sizes = [16, 16], strides = [1, 1]} : vector<128x16xf32> to vector<16x16xf32>
    %46 = vector.extract_strided_slice %27 {offsets = [80, 0], sizes = [16, 16], strides = [1, 1]} : vector<128x16xf32> to vector<16x16xf32>
    %47 = arith.mulf %45, %31 : vector<16x16xf32>
    %48 = arith.addf %47, %46 : vector<16x16xf32>
    %c0_53 = arith.constant 0 : index
    %c1_54 = arith.constant 1 : index
    %c0_55 = arith.constant 0 : index
    %c0_56 = arith.constant 0 : index
    %49 = vector.load %arg6[%c0_53, %c1_54, %c0_55, %c0_56] : memref<1x4x16x16xf32, #tpu.memory_space<vmem>>, vector<1x1x16x16xf32>
    %50 = vector.shape_cast %49 : vector<1x1x16x16xf32> to vector<16x16xf32>
    %51 = vector.shape_cast %48 : vector<16x16xf32> to vector<1x1x16x16xf32>
    tpu.vector_store %arg6[%c0_53, %c1_54, %c0_55, %c0_56], %51 {strides = array<i32>} : memref<1x4x16x16xf32, #tpu.memory_space<vmem>>, vector<1x1x16x16xf32>,
    %52 = vector.extract_strided_slice %27 {offsets = [32, 0], sizes = [16, 16], strides = [1, 1]} : vector<128x16xf32> to vector<16x16xf32>
    %53 = vector.extract_strided_slice %27 {offsets = [96, 0], sizes = [16, 16], strides = [1, 1]} : vector<128x16xf32> to vector<16x16xf32>
    %54 = arith.mulf %52, %33 : vector<16x16xf32>
    %55 = arith.addf %54, %53 : vector<16x16xf32>
    %c0_57 = arith.constant 0 : index
    %c2_58 = arith.constant 2 : index
    %c0_59 = arith.constant 0 : index
    %c0_60 = arith.constant 0 : index
    %56 = vector.load %arg6[%c0_57, %c2_58, %c0_59, %c0_60] : memref<1x4x16x16xf32, #tpu.memory_space<vmem>>, vector<1x1x16x16xf32>
    %57 = vector.shape_cast %56 : vector<1x1x16x16xf32> to vector<16x16xf32>
    %58 = vector.shape_cast %55 : vector<16x16xf32> to vector<1x1x16x16xf32>
    tpu.vector_store %arg6[%c0_57, %c2_58, %c0_59, %c0_60], %58 {strides = array<i32>} : memref<1x4x16x16xf32, #tpu.memory_space<vmem>>, vector<1x1x16x16xf32>,
    %59 = vector.extract_strided_slice %27 {offsets = [48, 0], sizes = [16, 16], strides = [1, 1]} : vector<128x16xf32> to vector<16x16xf32>
    %60 = vector.extract_strided_slice %27 {offsets = [112, 0], sizes = [16, 16], strides = [1, 1]} : vector<128x16xf32> to vector<16x16xf32>
    %61 = arith.mulf %59, %37 : vector<16x16xf32>
    %62 = arith.addf %61, %60 : vector<16x16xf32>
    %c0_61 = arith.constant 0 : index
    %c3_62 = arith.constant 3 : index
    %c0_63 = arith.constant 0 : index
    %c0_64 = arith.constant 0 : index
    %63 = vector.load %arg6[%c0_61, %c3_62, %c0_63, %c0_64] : memref<1x4x16x16xf32, #tpu.memory_space<vmem>>, vector<1x1x16x16xf32>
    %64 = vector.shape_cast %63 : vector<1x1x16x16xf32> to vector<16x16xf32>
    %65 = vector.shape_cast %62 : vector<16x16xf32> to vector<1x1x16x16xf32>
    tpu.vector_store %arg6[%c0_61, %c3_62, %c0_63, %c0_64], %65 {strides = array<i32>} : memref<1x4x16x16xf32, #tpu.memory_space<vmem>>, vector<1x1x16x16xf32>,
    return
  }
  func.func @transform_0(%arg0: i32, %arg1: i32) -> (i32, i32, i32, i32) {
    %c0_i32 = arith.constant 0 : i32
    %c0_i32_0 = arith.constant 0 : i32
    %c0_i32_1 = arith.constant 0 : i32
    return %arg0, %c0_i32, %arg1, %c0_i32_0 : i32, i32, i32, i32
  }
  func.func @transform_1(%arg0: i32, %arg1: i32) -> (i32, i32, i32, i32) {
    %c0_i32 = arith.constant 0 : i32
    %c0_i32_0 = arith.constant 0 : i32
    %c0_i32_1 = arith.constant 0 : i32
    %c0_i32_2 = arith.constant 0 : i32
    return %arg0, %c0_i32, %c0_i32_0, %c0_i32_1 : i32, i32, i32, i32
  }
  func.func @transform_2(%arg0: i32, %arg1: i32) -> (i32, i32) {
    %c0_i32 = arith.constant 0 : i32
    %c0_i32_0 = arith.constant 0 : i32
    return %arg1, %c0_i32 : i32, i32
  }
  func.func @transform_3(%arg0: i32, %arg1: i32) -> (i32, i32) {
    %c0_i32 = arith.constant 0 : i32
    %c0_i32_0 = arith.constant 0 : i32
    %c0_i32_1 = arith.constant 0 : i32
    return %c0_i32, %c0_i32_0 : i32, i32
  }
  func.func @transform_4(%arg0: i32, %arg1: i32) -> (i32, i32, i32, i32) {
    %c0_i32 = arith.constant 0 : i32
    %c0_i32_0 = arith.constant 0 : i32
    %c0_i32_1 = arith.constant 0 : i32
    return %arg0, %c0_i32, %arg1, %c0_i32_0 : i32, i32, i32, i32
  }
}

</mosaic_0001>

<bundles_post_ra>
// kernel: deep_guided_filter_refiner.3
= control target key start
LH: loop header
LB: loop body
LE: loop exit
PB: predicated region body
PF: predicated region fallthrough
CT: control target
= control target key end

     0   :  { %s1500_s15 = smov 0   ;;  %s1502_s16 = smov 0   ;;  %s1603_s0 = inlined_call_operand.vmem [shape: f32[2,3,16,16], index: 0, kind: input, shape index: {}]   ;;  %s1604_s1 = inlined_call_operand.vmem [shape: f32[2,8,8,8], index: 1, kind: input, shape index: {}]   ;;  %s1605_s2 = inlined_call_operand.vmem [shape: f32[16,8], index: 2, kind: input, shape index: {}]   ;;  %s1606_s3 = inlined_call_operand.vmem [shape: f32[8,16], index: 3, kind: input, shape index: {}]   ;;  %s1607_s4 = inlined_call_operand.vmem [shape: f32[2,4,16,16], index: 4, kind: output, shape index: {}]  }
   0x1   :  { %s1504_s17 = smov 0  }
   0x2 LB: > { %s26_s18 = sadd.s32 1, %s1469_s16  ;;  %p1258_p0 = scmp.ge.s32.totalorder %s1473_s17, 1  ;;  %s1473_s17 = sphi %s1504_s17, %s14_s17   ;;  %s1469_s16 = sphi %s1502_s16, %s1609_s16   ;;  %s1465_s15 = sphi %s1500_s15, %s1608_s15  }
   0x3   : > { %p28_p1 = scmp.ge.s32.totalorder %s26_s18, 2  ;;  %p204_p2 = scmp.lt.s32.totalorder %s1473_s17, 3 }
   0x5   : > { %s1611_s18 = smov (%p28_p1, %s26_s18), 0  ;;  %p205_p3 = pnand %p1258_p0, %p204_p2 }
   0x6   : > { %p249_p4 = scmp.lt.s32.totalorder (!%p205_p3), %s1465_s15, 1  ;;  %v279_v0 = vld [vmem:[%s1605_s2] sm:$0xff] (!%p205_p3)  ;;  %vm282_vm0 = vcmask (!%p205_p3), 64512   ;;  %v280_v1 = vld [vmem:[%s1605_s2 + $0x8] sm:$0xff] (!%p205_p3)  ;;  %vm1115_vm1 = vcmask (!%p205_p3), 130048  }
   0x7   : > { %208 = sbr.rel (%p205_p3) target bundleno = 470 (0x1d6), region = 36  ;;  %1360 = vmatprep.mubr.msk.f32.mxu0 (!%p205_p3), %vm282_vm0, %v279_v0  ;;  %1365 = vmatprep.mubr.msk.f32.mxu1 (!%p205_p3), %vm282_vm0, %v279_v0  ;;  %v903_v10 = vld [vmem:[%s1606_s3] sm:$0xff] (!%p205_p3) }
   0xe   : > { %s1613_s15 = smov (!%p249_p4, %s1465_s15), 1 }
   0xf   : > { %s1315_s21 = sshll.u32 %s1613_s15, 6  ;;  %s1426_s29 = smul.u32 48, %s1613_s15 }
  0x10   : > { %s262_s24 = scalar_lea.vmem %s1604_s1, %s1315_s21  ;;  %s1576_s9 = scalar_lea.vmem %s1607_s4, %s1315_s21 }
  0x11   : > { %v281_v2 = vld [vmem:[%s262_s24] sm:$0xff]  ;;  %v1269_v3 = vld [vmem:[%s262_s24 + $0x10] sm:$0xff]  ;;  %v1266_v4 = vld [vmem:[%s262_s24 + $0x8] sm:$0xff]  ;;  %s256_s6 = scalar_lea.vmem %s1603_s0, %s1426_s29 }
  0x12   : > { %1358 = vmatprep.subr.mxu0 %v281_v2  ;;  %1363 = vmatprep.subr.mxu1 %v1266_v4  ;;  %v1272_v5 = vld [vmem:[%s262_s24 + $0x18] sm:$0xff]  ;;  %v1275_v6 = vld [vmem:[%s262_s24 + $0x20] sm:$0xff]  ;;  %v1278_v7 = vld [vmem:[%s262_s24 + $0x28] sm:$0xff] }
  0x13   : > { %1359 = vmatpush3.msra.mxu0 %v281_v2  ;;  %1364 = vmatpush3.msra.mxu1 %v1266_v4  ;;  %v1281_v8 = vld [vmem:[%s262_s24 + $0x30] sm:$0xff]  ;;  %v1284_v9 = vld [vmem:[%s262_s24 + $0x38] sm:$0xff]  ;;  %v1098_v29 = vld [vmem:[%s256_s6 + $0x8] sm:$0xff] }
  0x14   : > { %1361 = vmatmul.mubr.msk.f32.vlgmr.msra.gmra.mrb[0].mxu0 %vm282_vm0, %v280_v1  ;;  %1368 = vmatprep.subr.mxu0 %v1269_v3  ;;  %v1097_v31 = vld [vmem:[%s256_s6] sm:$0xff]  ;;  %v1304_v33 = vld [vmem:[%s256_s6 + $0x18] sm:$0xff]  ;;  %v1303_v36 = vld [vmem:[%s256_s6 + $0x10] sm:$0xff] }
  0x15   : > { %1369 = vmatpush3.msra.mxu0 %v1269_v3  ;;  %1370 = vmatprep.mubr.msk.f32.mxu0 %vm282_vm0, %v279_v0  ;;  %v1106_v35 = vadd.f32 %v1304_v33, %v1098_v29  ;;  %v1105_v38 = vadd.f32 %v1303_v36, %v1097_v31  ;;  %v1306_v40 = vld [vmem:[%s256_s6 + $0x28] sm:$0xff]  ;;  %v1305_v44 = vld [vmem:[%s256_s6 + $0x20] sm:$0xff] }
  0x16   : > { %1366 = vmatmul.mubr.msk.f32.vlgmr.msra.gmra.mrb[0].mxu1 %vm282_vm0, %v280_v1  ;;  %1373 = vmatprep.subr.mxu1 %v1272_v5 }
  0x17   : > { %1378 = vmatprep.subr.mxu0 %v1275_v6  ;;  %1374 = vmatpush3.msra.mxu1 %v1272_v5  ;;  %v1108_v48 = vadd.f32 %v1306_v40, %v1106_v35  ;;  %v1107_v50 = vadd.f32 %v1305_v44, %v1105_v38 }
  0x18   : > { %1371 = vmatmul.mubr.msk.f32.vlgmr.msra.gmra.mrb[2].mxu0 %vm282_vm0, %v280_v1  ;;  %1375 = vmatprep.mubr.msk.f32.mxu1 %vm282_vm0, %v279_v0 }
  0x19   : > { %1379 = vmatpush3.msra.mxu0 %v1275_v6  ;;  %1380 = vmatprep.mubr.msk.f32.mxu0 %vm282_vm0, %v279_v0  ;;  %v1110_v58 = vmul.f32 0.33333334, %v1108_v48  ;;  %v1109_v60 = vmul.f32 0.33333334, %v1107_v50 }
  0x1a   : > { %1376 = vmatmul.mubr.msk.f32.vlgmr.msra.gmra.mrb[2].mxu1 %vm282_vm0, %v280_v1  ;;  %1383 = vmatprep.subr.mxu1 %v1278_v7 }
  0x1b   : > { %1384 = vmatpush3.msra.mxu1 %v1278_v7  ;;  %1385 = vmatprep.mubr.msk.f32.mxu1 %vm282_vm0, %v279_v0 }
  0x1c   : > { %1381 = vmatmul.mubr.msk.f32.vlgmr.msra.gmra.mrb[4].mxu0 %vm282_vm0, %v280_v1  ;;  %1388 = vmatprep.subr.mxu0 %v1281_v8 }
  0x1d   : > { %1389 = vmatpush3.msra.mxu0 %v1281_v8  ;;  %1390 = vmatprep.mubr.msk.f32.mxu0 %vm282_vm0, %v279_v0 }
  0x1e   : > { %1386 = vmatmul.mubr.msk.f32.vlgmr.msra.gmra.mrb[4].mxu1 %vm282_vm0, %v280_v1  ;;  %1393 = vmatprep.subr.mxu1 %v1284_v9 }
  0x1f   : > { %1394 = vmatpush3.msra.mxu1 %v1284_v9  ;;  %1395 = vmatprep.mubr.msk.f32.mxu1 %vm282_vm0, %v279_v0 }
  0x20   : > { %1391 = vmatmul.mubr.msk.f32.vlgmr.msra.gmra.mrb[6].mxu0 %vm282_vm0, %v280_v1  ;;  %1398 = vmatprep.subr.mxu0 %v903_v10 }
  0x21   : > { %1424 = vmatprep.subr.mxu1 %v903_v10  ;;  %1399 = vmatpush3.msra.mxu0 %v903_v10 }
  0x22   : > { %1396 = vmatmul.mubr.msk.f32.vlgmr.msra.gmra.mrb[6].mxu1 %vm282_vm0, %v280_v1 }
  0x23   : > { %1425 = vmatpush3.msra.mxu1 %v903_v10 }
  0xe7   : > { %v1362_v11 = vpop.f32.mrb[0].mxu0 }
  0xe8   : > { %v355_v12 = vpop.f32.mrb[1].mxu0 }
  0xe9   : > { %1400 = vmatprep.mubr.msk.f32.mxu0 %vm282_vm0, %v355_v12  ;;  %v1367_v13 = vpop.f32.mrb[0].mxu1 }
  0xea   : > { %1401 = vmatmul.mubr.msk.f32.vlgmr.msra.gmra.mrb[8].mxu0 %vm282_vm0, %v1362_v11  ;;  %v432_v14 = vpop.f32.mrb[1].mxu1 }
  0xeb   : > { %v1372_v15 = vpop.f32.mrb[2].mxu0  ;;  %1403 = vmatprep.mubr.msk.f32.mxu0 %vm282_vm0, %v432_v14 }
  0xec   : > { %v509_v16 = vpop.f32.mrb[3].mxu0 }
  0xed   : > { %v1377_v17 = vpop.f32.mrb[2].mxu1 }
  0xee   : > { %1404 = vmatmul.mubr.msk.f32.gmra.mrb[10].mxu0 %vm282_vm0, %v1367_v13  ;;  %v586_v18 = vpop.f32.mrb[3].mxu1 }
  0xef   : > { %v1382_v19 = vpop.f32.mrb[4].mxu0  ;;  %1406 = vmatprep.mubr.msk.f32.mxu0 %vm282_vm0, %v509_v16 }
  0xf0   : > { %v663_v20 = vpop.f32.mrb[5].mxu0 }
  0xf1   : > { %1412 = vmatprep.mubr.msk.f32.mxu1 %vm282_vm0, %v663_v20  ;;  %v1387_v21 = vpop.f32.mrb[4].mxu1 }
  0xf2   : > { %1407 = vmatmul.mubr.msk.f32.gmra.mrb[12].mxu0 %vm282_vm0, %v1372_v15  ;;  %1413 = vmatmul.mubr.msk.f32.vlgmr.msra.gmra.mrb[8].mxu1 %vm282_vm0, %v1382_v19  ;;  %v740_v22 = vpop.f32.mrb[5].mxu1 }
  0xf3   : > { %1409 = vmatprep.mubr.msk.f32.mxu0 %vm282_vm0, %v586_v18  ;;  %1415 = vmatprep.mubr.msk.f32.mxu1 %vm282_vm0, %v740_v22  ;;  %v1392_v23 = vpop.f32.mrb[6].mxu0 }
  0xf4   : > { %v817_v24 = vpop.f32.mrb[7].mxu0 }
  0xf5   : > { %v1397_v25 = vpop.f32.mrb[6].mxu1 }
  0xf6   : > { %1410 = vmatmul.mubr.msk.f32.gmra.mrb[14].mxu0 %vm282_vm0, %v1377_v17  ;;  %1416 = vmatmul.mubr.msk.f32.gmra.mrb[10].mxu1 %vm282_vm0, %v1387_v21  ;;  %v894_v26 = vpop.f32.mrb[7].mxu1 }
  0xf7   : > { %1418 = vmatprep.mubr.msk.f32.mxu1 %vm282_vm0, %v817_v24 }
  0xfa   : > { %1419 = vmatmul.mubr.msk.f32.gmra.mrb[12].mxu1 %vm282_vm0, %v1392_v23 }
  0xfb   : > { %1421 = vmatprep.mubr.msk.f32.mxu1 %vm282_vm0, %v894_v26 }
  0xfe   : > { %1422 = vmatmul.mubr.msk.f32.gmra.mrb[14].mxu1 %vm282_vm0, %v1397_v25 }
 0x1bd   : > { %v1402_v27 = vpop.f32.mrb[8].mxu0 }
 0x1be   : > { %v1018_v28 = vpop.f32.mrb[9].mxu0  ;;  %v1112_v34 = vmul.f32 %v1402_v27, %v1098_v29 }
 0x1bf   : > { %v1111_v37 = vmul.f32 %v1097_v31, %v1018_v28 }
 0x1c1   : > { %v1405_v30 = vpop.f32.mrb[10].mxu0 }
 0x1c2   : > { %v1028_v32 = vpop.f32.mrb[11].mxu0  ;;  %v1119_v47 = vmul.f32 %v1405_v30, %v1304_v33 }
 0x1c3   : > { %v1118_v49 = vmul.f32 %v1303_v36, %v1028_v32 }
 0x1c5   : > { %v1408_v39 = vpop.f32.mrb[12].mxu0  ;;  %v1414_v41 = vpop.f32.mrb[8].mxu1 }
 0x1c6   : > { %v1114_v42 = vadd.f32 %v1414_v41, %v1112_v34  ;;  %v1038_v43 = vpop.f32.mrb[13].mxu0  ;;  %v1058_v45 = vpop.f32.mrb[9].mxu1  ;;  %v1126_v57 = vmul.f32 %v1408_v39, %v1306_v40 }
 0x1c7   : > { %v1113_v46 = vadd.f32 %v1111_v37, %v1058_v45  ;;  %v1125_v59 = vmul.f32 %v1305_v44, %v1038_v43 }
 0x1c8   : > { %1117 = vst.msk [vmem:[%s1576_s9 + $0x8] sm:$0xff] %vm1115_vm1, %v1114_v42 }
 0x1c9   : > { %1116 = vst.msk [vmem:[%s1576_s9] sm:$0xff] %vm1115_vm1, %v1113_v46  ;;  %v1411_v51 = vpop.f32.mrb[14].mxu0  ;;  %v1417_v52 = vpop.f32.mrb[10].mxu1 }
 0x1ca   : > { %v1121_v53 = vadd.f32 %v1417_v52, %v1119_v47  ;;  %v1048_v54 = vpop.f32.mrb[15].mxu0  ;;  %v1068_v55 = vpop.f32.mrb[11].mxu1  ;;  %v1133_v1 = vmul.f32 %v1411_v51, %v1110_v58 }
 0x1cb   : > { %v1120_v56 = vadd.f32 %v1118_v49, %v1068_v55  ;;  %v1132_v2 = vmul.f32 %v1109_v60, %v1048_v54 }
 0x1cc   : > { %1308 = vst.msk [vmem:[%s1576_s9 + $0x18] sm:$0xff] %vm1115_vm1, %v1121_v53 }
 0x1cd   : > { %1307 = vst.msk [vmem:[%s1576_s9 + $0x10] sm:$0xff] %vm1115_vm1, %v1120_v56  ;;  %v1420_v61 = vpop.f32.mrb[12].mxu1 }
 0x1ce   : > { %v1128_v62 = vadd.f32 %v1420_v61, %v1126_v57  ;;  %v1078_v63 = vpop.f32.mrb[13].mxu1 }
 0x1cf   : > { %v1127_v0 = vadd.f32 %v1125_v59, %v1078_v63 }
 0x1d0   : > { %1310 = vst.msk [vmem:[%s1576_s9 + $0x28] sm:$0xff] %vm1115_vm1, %v1128_v62 }
 0x1d1   : > { %1309 = vst.msk [vmem:[%s1576_s9 + $0x20] sm:$0xff] %vm1115_vm1, %v1127_v0  ;;  %v1423_v3 = vpop.f32.mrb[14].mxu1 }
 0x1d2   : > { %v1135_v4 = vadd.f32 %v1423_v3, %v1133_v1  ;;  %v1088_v5 = vpop.f32.mrb[15].mxu1 }
 0x1d3   : > { %v1134_v6 = vadd.f32 %v1132_v2, %v1088_v5 }
 0x1d4   : > { %1312 = vst.msk [vmem:[%s1576_s9 + $0x38] sm:$0xff] %vm1115_vm1, %v1135_v4 }
 0x1d5   : > { %1311 = vst.msk [vmem:[%s1576_s9 + $0x30] sm:$0xff] %vm1115_vm1, %v1134_v6 }
 0x1d6 PF: > { %s14_s17 = sadd.s32 1, %s1473_s17   ;;  %s1608_s15 = smov %s1469_s16 }
 0x1d7   : > { %p11_p5 = scmp.ge.s32.totalorder %s14_s17, 4   ;;  %s1609_s16 = smov %s1611_s18 }
 0x1d9   :  { %13 = sbr.rel (!%p11_p5) target bundleno = 2 (0x2), region = 84 }

// kernel: deep_guided_filter_refiner.2
= control target key start
LH: loop header
LB: loop body
LE: loop exit
PB: predicated region body
PF: predicated region fallthrough
CT: control target
= control target key end

     0   :  { %s3288_s21 = smov 0   ;;  %s3663_s0 = inlined_call_operand.vmem [shape: f32[2,3,8,8], index: 0, kind: input, shape index: {}]   ;;  %s3664_s1 = inlined_call_operand.vmem [shape: f32[2,3,8,8], index: 1, kind: input, shape index: {}]   ;;  %s3665_s2 = inlined_call_operand.vmem [shape: f32[2,1,8,8], index: 2, kind: input, shape index: {}]   ;;  %s3666_s3 = inlined_call_operand.vmem [shape: f32[2,16,8,8], index: 3, kind: input, shape index: {}]   ;;  %s3667_s4 = inlined_call_operand.vmem [shape: f32[8,8], index: 4, kind: input, shape index: {}, may-alias: {4,5}]   ;;  %s3668_s5 = inlined_call_operand.vmem [shape: f32[8,8], index: 5, kind: input, shape index: {}, may-alias: {4,5}]   ;;  %s3669_s6 = inlined_call_operand.vmem [shape: f32[16,24], index: 6, kind: input, shape index: {}]   ;;  %s3670_s7 = inlined_call_operand.vmem [shape: f32[16,1], index: 7, kind: input, shape index: {}]   ;;  %s3671_s8 = inlined_call_operand.vmem [shape: f32[16,16], index: 8, kind: input, shape index: {}]   ;;  %s3672_s9 = inlined_call_operand.vmem [shape: f32[16,1], index: 9, kind: input, shape index: {}]   ;;  %s3673_s10 = inlined_call_operand.vmem [shape: f32[4,16], index: 10, kind: input, shape index: {}]   ;;  %s3674_s11 = inlined_call_operand.vmem [shape: f32[4,1], index: 11, kind: input, shape index: {}]   ;;  %s3675_s12 = inlined_call_operand.vmem [shape: f32[2,8,8,8], index: 12, kind: output, shape index: {}]  }
   0x1 LB: > { %s2847_s22 = sadd.s32 4294967295, %s3201_s21   ;;  %p2851_p0 = scmp.ge.s32.totalorder %s3201_s21, 1  ;;  %s3201_s21 = sphi %s3288_s21, %s22_s21  }
   0x2   : > { %p391_p1 = scmp.lt.s32.totalorder %s3201_s21, 3 }
   0x4   : > { %p392_p2 = pnand %p2851_p0, %p391_p1 }
   0x5   : > { %v489_v0 = vld [vmem:[%s3667_s4] sm:$0xff] (!%p392_p2)  ;;  %p447_p3 = scmp.lt.s32.totalorder (!%p392_p2), %s2847_s22, 1  ;;  %vm490_vm0 = vcmask (!%p392_p2), 64512   ;;  %v3203_v19 = vmov (!%p392_p2), 0.0   ;;  %vm3204_vm1 = vmmov (!%p392_p2), 0   ;;  %v1861_v39 = vlaneseq (!%p392_p2)  ;;  %s3208_s27 = smov (!%p392_p2), 24  }
   0x6   : > { %395 = sbr.rel (%p392_p2) target bundleno = 1446 (0x5a6), region = 68  ;;  %2965 = vmatprep.subr.mxu0 (!%p392_p2), %v489_v0  ;;  %2991 = vmatprep.subr.mxu1 (!%p392_p2), %v3203_v19  ;;  %v3343_v21 = vld [vmem:[%s3668_s5] sm:$0xff] (!%p392_p2)  ;;  %v3205_v37 = vmov (!%p392_p2), 1983009808   ;;  %v3206_v42 = vmov (!%p392_p2), 1934713408  }
   0x7   : > { %2966 = vmatpush3.msra.mxu0 (!%p392_p2), %v489_v0  ;;  %2993 = vmatprep.mubr.msk.f32.mxu1 (!%p392_p2), %vm3204_vm1, %v3203_v19  ;;  %v1859_v38 = vunpack.c.l.s4 (!%p392_p2), %v3205_v37  ;;  %v1862_v41 = vshrl.u32 (!%p392_p2), %v1861_v39, 7  ;;  %v1923_v43 = vunpack.c.l.s4 (!%p392_p2), %v3206_v42  ;;  %s3209_s28 = smov (!%p392_p2), 16   ;;  %s3211_s30 = smov (!%p392_p2), 48   ;;  %vm2355_vm2 = vcmask (!%p392_p2), 195584  }
   0x8   : > { %3031 = vmatprep.subr.mxu0 (!%p392_p2), %v3203_v19  ;;  %s3212_s13 = smov (!%p392_p2), 40   ;;  %s3214_s16 = smov (!%p392_p2), 56   ;;  %vm2351_vm3 = vcmask (!%p392_p2), 130048   ;;  %vm2359_vm4 = vcmask (!%p392_p2), 261120   ;;  %vm2363_vm5 = vcmask (!%p392_p2), 326656   ;;  %vm2367_vm6 = vcmask (!%p392_p2), 392192  }
   0x9   : > { %v1860_v40 = vunpack.c.0.s8 (!%p392_p2), %v1859_v38  ;;  %v1924_v48 = vunpack.c.0.s8 (!%p392_p2), %v1923_v43  ;;  %vm2371_vm7 = vcmask (!%p392_p2), 457728   ;;  %s3216_s19 = smov (!%p392_p2), 112   ;;  %s3217_s20 = smov (!%p392_p2), 120  }
   0xa   : > { %s3219_s24 = smov (!%p392_p2), 104  }
   0xb   : > { %v3419_v44 = vsub.s32 (!%p392_p2), %v1860_v40, %v1862_v41  ;;  %v3428_v53 = vsub.s32 (!%p392_p2), %v1924_v48, %v1862_v41 }
   0xd   : > { %s3677_s22 = smov (!%p447_p3, %s2847_s22), 1 }
   0xe   : > { %s3105_s25 = smul.u32 24, %s3677_s22  ;;  %s2902_s26 = sshll.u32 %s3677_s22, 7 }
   0xf   : > { %s3306_s29 = scalar_lea.vmem %s3666_s3, %s2902_s26  ;;  %s2854_s18 = sshll.u32 %s3677_s22, 3 }
  0x10   : > { %s451_s14 = scalar_lea.vmem %s3663_s0, %s3105_s25  ;;  %s456_s17 = scalar_lea.vmem %s3664_s1, %s3105_s25  ;;  %v3171_v45 = vld [vmem:[%s3306_s29 + $0x40] ss:$16 sps:$4 sm:$0xff]   ;;  %v3174_v46 = vld [vmem:[%s3306_s29 + $0x48] ss:$16 sps:$4 sm:$0xff]  }
  0x11   : > { %v471_v1 = vld [vmem:[%s451_s14] sm:$0xff]  ;;  %v472_v2 = vld [vmem:[%s451_s14 + $0x8] sm:$0xff]  ;;  %v473_v3 = vld [vmem:[%s451_s14 + $0x10] sm:$0xff]  ;;  %s460_s23 = scalar_lea.vmem %s3665_s2, %s2854_s18  ;;  %v2136_v50 = vrot.slane %v3171_v45, %v3419_v44  ;;  %v2152_v51 = vrot.slane %v3174_v46, %v3419_v44  ;;  %s3207_s26 = smov 8  }
  0x12   : > { %2967 = vmatprep.mubr.msk.f32.mxu0 %vm490_vm0, %v471_v1  ;;  %v474_v4 = vadd.f32 %v472_v2, %v471_v1  ;;  %v477_v6 = vld [vmem:[%s456_s17] sm:$0xff]  ;;  %v478_v8 = vld [vmem:[%s456_s17 + $0x8] sm:$0xff]  ;;  %v479_v9 = vld [vmem:[%s456_s17 + $0x10] sm:$0xff]  ;;  %v485_v15 = vmul.f32 %v471_v1, %v471_v1  ;;  %v486_v16 = vmul.f32 %v472_v2, %v472_v2  ;;  %v487_v17 = vmul.f32 %v473_v3, %v473_v3  ;;  %s3220_s25 = smov 80  }
  0x13   : > { %2968 = vmatmul.mubr.msk.f32.vlgmr.msra.gmra.mrb[0].mxu0 %vm490_vm0, %v472_v2  ;;  %v481_v10 = vmul.f32 %v477_v6, %v471_v1  ;;  %v480_v11 = vld [vmem:[%s460_s23] sm:$0xff]  ;;  %v482_v12 = vmul.f32 %v478_v8, %v472_v2  ;;  %v483_v13 = vmul.f32 %v479_v9, %v473_v3  ;;  %v3180_v49 = vld [vmem:[%s3306_s29 + $0x68] ss:$16 sps:$4 sm:$0xff]   ;;  %v2192_v55 = vcombine.low %v2136_v50, %v2152_v51  ;;  %s3218_s23 = smov 96  }
  0x14   : > { %v475_v5 = vadd.f32 %v474_v4, %v473_v3  ;;  %2970 = vmatprep.mubr.msk.f32.mxu0 %vm490_vm0, %v473_v3  ;;  %v3177_v47 = vld [vmem:[%s3306_s29 + $0x60] ss:$16 sps:$4 sm:$0xff]   ;;  %v2184_v54 = vrot.slane %v3180_v49, %v3419_v44  ;;  %v3185_v60 = vld [vmem:[%s3306_s29 + $0x8] ss:$16 sps:$4 sm:$0xff]   ;;  %v2193_v62 = vcombine.high %v2136_v50, %v2152_v51 }
  0x15   : > { %v2168_v52 = vrot.slane %v3177_v47, %v3419_v44  ;;  %v3432_v57 = vrot.slane %v2192_v55, %v3428_v53  ;;  %v3183_v59 = vld [vmem:[%s3306_s29] ss:$16 sps:$4 sm:$0xff]   ;;  %v3189_v0 = vld [vmem:[%s3306_s29 + $0x28] ss:$16 sps:$4 sm:$0xff]   ;;  %v3447_v3 = vrot.slane %v3185_v60, %v3419_v44 }
  0x16   : > { %v476_v7 = vmul.f32 0.33333334, %v475_v5  ;;  %v3187_v61 = vld [vmem:[%s3306_s29 + $0x20] ss:$16 sps:$4 sm:$0xff]   ;;  %v3444_v2 = vrot.slane %v3183_v59, %v3419_v44  ;;  %v2207_v5 = vrot.slane %v2193_v62, %v3428_v53 }
  0x17   : > { %v2224_v56 = vcombine.low %v2168_v52, %v2184_v54  ;;  %v2225_v63 = vcombine.high %v2168_v52, %v2184_v54  ;;  %v3450_v4 = vrot.slane %v3187_v61, %v3419_v44 }
  0x18   : > { %2971 = vmatmul.mubr.msk.f32.gmra.mrb[2].mxu0 %vm490_vm0, %v476_v7  ;;  %v484_v14 = vmul.f32 %v480_v11, %v476_v7  ;;  %v488_v18 = vmul.f32 %v476_v7, %v476_v7  ;;  %v3455_v7 = vrot.slane %v3189_v0, %v3419_v44 }
  0x19   : > { %2973 = vmatprep.mubr.msk.f32.mxu0 %vm490_vm0, %v477_v6  ;;  %v3435_v58 = vrot.slane %v2224_v56, %v3428_v53  ;;  %v2239_v6 = vrot.slane %v2225_v63, %v3428_v53 }
  0x1b   : > { %v2257_v1 = vcombine.high %v3432_v57, %v3435_v58 }
  0x1c   : > { %2974 = vmatmul.mubr.msk.f32.gmra.mrb[4].mxu0 %vm490_vm0, %v478_v8  ;;  %v2256_v8 = vcombine.low %v3432_v57, %v3435_v58 }
  0x1d   : > { %2976 = vmatprep.mubr.msk.f32.mxu0 %vm490_vm0, %v479_v9  ;;  %2271 = vrot.lane.b32.xlu0 %v2257_v1, %s3207_s26  ;;  %v2259_v9 = vcombine.high %v2207_v5, %v2239_v6 }
  0x1f   : > { %2295 = vrot.lane.b32.xlu1 %v2259_v9, %s3208_s27 }
  0x20   : > { %2977 = vmatmul.mubr.msk.f32.gmra.mrb[6].mxu0 %vm490_vm0, %v480_v11  ;;  %v2056_v11 = vcombine.low %v3444_v2, %v3447_v3 }
  0x21   : > { %2979 = vmatprep.mubr.msk.f32.mxu0 %vm490_vm0, %v481_v10  ;;  %v2258_v10 = vcombine.low %v2207_v5, %v2239_v6 }
  0x23   : > { %2283 = vrot.lane.b32.xlu0 %v2258_v10, %s3209_s28 }
  0x24   : > { %2980 = vmatmul.mubr.msk.f32.gmra.mrb[8].mxu0 %vm490_vm0, %v482_v12  ;;  %v2088_v12 = vcombine.low %v3450_v4, %v3455_v7 }
  0x25   : > { %2982 = vmatprep.mubr.msk.f32.mxu0 %vm490_vm0, %v483_v13  ;;  %v3467_v13 = vrot.slane %v2056_v11, %v3428_v53 }
  0x28   : > { %2983 = vmatmul.mubr.msk.f32.gmra.mrb[10].mxu0 %vm490_vm0, %v484_v14  ;;  %v3470_v14 = vrot.slane %v2088_v12, %v3428_v53 }
  0x29   : > { %2985 = vmatprep.mubr.msk.f32.mxu0 %vm490_vm0, %v485_v15 }
  0x2a   : > { %v2120_v15 = vcombine.low %v3467_v13, %v3470_v14 }
  0x2c   : > { %2986 = vmatmul.mubr.msk.f32.gmra.mrb[12].mxu0 %vm490_vm0, %v486_v16 }
  0x2d   : > { %2988 = vmatprep.mubr.msk.f32.mxu0 %vm490_vm0, %v487_v17 }
  0x30   : > { %2989 = vmatmul.mubr.msk.f32.gmra.mrb[14].mxu0 %vm490_vm0, %v488_v18 }
  0x31   : > { %3033 = vmatprep.mubr.msk.f32.mxu0 %vm3204_vm1, %v3203_v19 }
  0xe6   : > { %v2969_v20 = vpop.f32.mrb[0].mxu0 }
  0xe7   : > { %v605_v22 = vpop.f32.mrb[1].mxu0 }
  0xe8   : > { %2992 = vmatpush3.msra.mxu1 %v605_v22 }
  0xe9   : > { %2994 = vmatmul.mubr.msk.f32.vlgmr.msra.gmra.mrb[0].mxu1 %vm490_vm0, %v3343_v21  ;;  %2996 = vmatprep.subr.mxu1 %v3203_v19 }
  0xea   : > { %2997 = vmatpush3.msra.mxu1 %v2969_v20  ;;  %2998 = vmatprep.mubr.msk.f32.mxu1 %vm3204_vm1, %v3203_v19 }
  0xeb   : > { %v2972_v23 = vpop.f32.mrb[2].mxu0  ;;  %3001 = vmatprep.subr.mxu1 %v3203_v19 }
  0xec   : > { %v615_v24 = vpop.f32.mrb[3].mxu0 }
  0xed   : > { %2999 = vmatmul.mubr.msk.f32.vlgmr.msra.gmra.mrb[2].mxu1 %vm490_vm0, %v3343_v21 }
  0xee   : > { %3002 = vmatpush3.msra.mxu1 %v615_v24  ;;  %3003 = vmatprep.mubr.msk.f32.mxu1 %vm3204_vm1, %v3203_v19 }
  0xef   : > { %v2975_v25 = vpop.f32.mrb[4].mxu0  ;;  %3006 = vmatprep.subr.mxu1 %v3203_v19 }
  0xf0   : > { %v625_v26 = vpop.f32.mrb[5].mxu0 }
  0xf1   : > { %3004 = vmatmul.mubr.msk.f32.vlgmr.msra.gmra.mrb[4].mxu1 %vm490_vm0, %v3343_v21 }
  0xf2   : > { %3007 = vmatpush3.msra.mxu1 %v2972_v23  ;;  %3008 = vmatprep.mubr.msk.f32.mxu1 %vm3204_vm1, %v3203_v19 }
  0xf3   : > { %v2978_v27 = vpop.f32.mrb[6].mxu0  ;;  %3011 = vmatprep.subr.mxu1 %v3203_v19 }
  0xf4   : > { %v635_v28 = vpop.f32.mrb[7].mxu0 }
  0xf5   : > { %3009 = vmatmul.mubr.msk.f32.vlgmr.msra.gmra.mrb[6].mxu1 %vm490_vm0, %v3343_v21 }
  0xf6   : > { %3012 = vmatpush3.msra.mxu1 %v625_v26  ;;  %3013 = vmatprep.mubr.msk.f32.mxu1 %vm3204_vm1, %v3203_v19 }
  0xf7   : > { %v2981_v29 = vpop.f32.mrb[8].mxu0  ;;  %3016 = vmatprep.subr.mxu1 %v3203_v19 }
  0xf8   : > { %v645_v30 = vpop.f32.mrb[9].mxu0 }
  0xf9   : > { %3014 = vmatmul.mubr.msk.f32.vlgmr.msra.gmra.mrb[8].mxu1 %vm490_vm0, %v3343_v21  ;;  %3032 = vmatpush3.msra.mxu0 %v645_v30 }
  0xfa   : > { %3017 = vmatpush3.msra.mxu1 %v2975_v25  ;;  %3034 = vmatmul.mubr.msk.f32.vlgmr.msra.gmra.mrb[16].mxu0 %vm490_vm0, %v3343_v21 }
  0xfb   : > { %v2984_v31 = vpop.f32.mrb[10].mxu0  ;;  %3018 = vmatprep.mubr.msk.f32.mxu1 %vm3204_vm1, %v3203_v19  ;;  %3021 = vmatprep.subr.mxu1 %v3203_v19 }
  0xfc   : > { %v655_v32 = vpop.f32.mrb[11].mxu0  ;;  %3041 = vmatprep.subr.mxu0 %v3203_v19  ;;  %3043 = vmatprep.mubr.msk.f32.mxu0 %vm3204_vm1, %v3203_v19 }
  0xfd   : > { %3019 = vmatmul.mubr.msk.f32.vlgmr.msra.gmra.mrb[10].mxu1 %vm490_vm0, %v3343_v21  ;;  %3042 = vmatpush3.msra.mxu0 %v655_v32 }
  0xfe   : > { %3022 = vmatpush3.msra.mxu1 %v635_v28  ;;  %3044 = vmatmul.mubr.msk.f32.vlgmr.msra.gmra.mrb[18].mxu0 %vm490_vm0, %v3343_v21 }
  0xff   : > { %v2987_v33 = vpop.f32.mrb[12].mxu0  ;;  %3023 = vmatprep.mubr.msk.f32.mxu1 %vm3204_vm1, %v3203_v19  ;;  %3026 = vmatprep.subr.mxu1 %v3203_v19 }
 0x100   : > { %v665_v34 = vpop.f32.mrb[13].mxu0  ;;  %3051 = vmatprep.subr.mxu0 %v3203_v19  ;;  %3053 = vmatprep.mubr.msk.f32.mxu0 %vm3204_vm1, %v3203_v19 }
 0x101   : > { %3024 = vmatmul.mubr.msk.f32.vlgmr.msra.gmra.mrb[12].mxu1 %vm490_vm0, %v3343_v21  ;;  %3052 = vmatpush3.msra.mxu0 %v665_v34 }
 0x102   : > { %3027 = vmatpush3.msra.mxu1 %v2978_v27  ;;  %3054 = vmatmul.mubr.msk.f32.vlgmr.msra.gmra.mrb[20].mxu0 %vm490_vm0, %v3343_v21 }
 0x103   : > { %v2990_v35 = vpop.f32.mrb[14].mxu0  ;;  %3028 = vmatprep.mubr.msk.f32.mxu1 %vm3204_vm1, %v3203_v19  ;;  %3036 = vmatprep.subr.mxu1 %v3203_v19 }
 0x104   : > { %v675_v36 = vpop.f32.mrb[15].mxu0  ;;  %3061 = vmatprep.subr.mxu0 %v3203_v19  ;;  %3063 = vmatprep.mubr.msk.f32.mxu0 %vm3204_vm1, %v3203_v19 }
 0x105   : > { %3029 = vmatmul.mubr.msk.f32.vlgmr.msra.gmra.mrb[14].mxu1 %vm490_vm0, %v3343_v21  ;;  %3062 = vmatpush3.msra.mxu0 %v675_v36 }
 0x106   : > { %3037 = vmatpush3.msra.mxu1 %v2981_v29  ;;  %3064 = vmatmul.mubr.msk.f32.vlgmr.msra.gmra.mrb[22].mxu0 %vm490_vm0, %v3343_v21 }
 0x107   : > { %3038 = vmatprep.mubr.msk.f32.mxu1 %vm3204_vm1, %v3203_v19  ;;  %3046 = vmatprep.subr.mxu1 %v3203_v19 }
 0x109   : > { %3039 = vmatmul.mubr.msk.f32.vlgmr.msra.gmra.mrb[16].mxu1 %vm490_vm0, %v3343_v21 }
 0x10a   : > { %3047 = vmatpush3.msra.mxu1 %v2984_v31  ;;  %3048 = vmatprep.mubr.msk.f32.mxu1 %vm3204_vm1, %v3203_v19 }
 0x10b   : > { %3056 = vmatprep.subr.mxu1 %v3203_v19 }
 0x10d   : > { %3049 = vmatmul.mubr.msk.f32.vlgmr.msra.gmra.mrb[18].mxu1 %vm490_vm0, %v3343_v21 }
 0x10e   : > { %3057 = vmatpush3.msra.mxu1 %v2987_v33  ;;  %3058 = vmatprep.mubr.msk.f32.mxu1 %vm3204_vm1, %v3203_v19 }
 0x10f   : > { %3066 = vmatprep.subr.mxu1 %v3203_v19 }
 0x111   : > { %3059 = vmatmul.mubr.msk.f32.vlgmr.msra.gmra.mrb[20].mxu1 %vm490_vm0, %v3343_v21 }
 0x112   : > { %3067 = vmatpush3.msra.mxu1 %v2990_v35  ;;  %3068 = vmatprep.mubr.msk.f32.mxu1 %vm3204_vm1, %v3203_v19 }
 0x115   : > { %3069 = vmatmul.mubr.msk.f32.vlgmr.msra.gmra.mrb[22].mxu1 %vm490_vm0, %v3343_v21 }
 0x1bc   : > { %v754_v16 = vpop.f32.mrb[0].mxu1 }
 0x1bd   : > { %v2995_v17 = vpop.f32.mrb[1].mxu1  ;;  %v3476_v34 = vmul.f32 0.11111111, %v754_v16 }
 0x1bf   : > { %v1832_v52 = vmul.f32 %v3476_v34, %v3476_v34 }
 0x1c0   : > { %v824_v18 = vpop.f32.mrb[2].mxu1 }
 0x1c1   : > { %v3000_v20 = vpop.f32.mrb[3].mxu1  ;;  %v3494_v10 = vmul.f32 0.11111111, %v824_v18  ;;  %v3194_v18 = vld [vmem:[%s3306_s29 + $0x2c] ss:$16 sps:$4 sm:$0xff]  }
 0x1c4   : > { %v894_v21 = vpop.f32.mrb[4].mxu1 }
 0x1c5   : > { %v3005_v22 = vpop.f32.mrb[5].mxu1  ;;  %v3478_v35 = vmul.f32 0.11111111, %v894_v21 }
 0x1c7   : > { %v1834_v55 = vmul.f32 %v3478_v35, %v3478_v35 }
 0x1c8   : > { %v964_v23 = vpop.f32.mrb[6].mxu1 }
 0x1c9   : > { %v3010_v24 = vpop.f32.mrb[7].mxu1  ;;  %v3496_v11 = vmul.f32 0.11111111, %v964_v23 }
 0x1ca   : > { %v3191_v24 = vld [vmem:[%s3306_s29 + $0x4] ss:$16 sps:$4 sm:$0xff]  }
 0x1cc   : > { %v1034_v25 = vpop.f32.mrb[8].mxu1 }
 0x1cd   : > { %v1314_v26 = vpop.f32.mrb[16].mxu0  ;;  %v3015_v27 = vpop.f32.mrb[9].mxu1  ;;  %v3474_v30 = vmul.f32 0.11111111, %v1034_v25 }
 0x1ce   : > { %v3035_v28 = vpop.f32.mrb[17].mxu0  ;;  %v1816_v36 = vmul.f32 0.11111111, %v1314_v26  ;;  %v3192_v27 = vld [vmem:[%s3306_s29 + $0xc] ss:$16 sps:$4 sm:$0xff]  }
 0x1cf   : > { %v1824_v38 = vmul.f32 %v3474_v30, %v3476_v34 }
 0x1d0   : > { %v1104_v29 = vpop.f32.mrb[10].mxu1 }
 0x1d1   : > { %v3020_v31 = vpop.f32.mrb[11].mxu1  ;;  %v1454_v32 = vpop.f32.mrb[18].mxu0  ;;  %v1828_v48 = vsub.f32 %v1816_v36, %v1824_v38  ;;  %v3490_v0 = vmul.f32 0.11111111, %v1104_v29  ;;  %v3193_v29 = vld [vmem:[%s3306_s29 + $0x24] ss:$16 sps:$4 sm:$0xff]   ;;  %v2089_v36 = vcombine.high %v3450_v4, %v3455_v7 }
 0x1d2   : > { %v3045_v33 = vpop.f32.mrb[19].mxu0  ;;  %v1818_v39 = vmul.f32 0.11111111, %v1454_v32 }
 0x1d3   : > { %v1825_v17 = vmul.f32 %v3490_v0, %v3494_v10  ;;  %v2057_v33 = vcombine.high %v3444_v2, %v3447_v3  ;;  %v2055_v2 = vrot.slane %v3194_v18, %v3419_v44 }
 0x1d4   : > { %v1174_v37 = vpop.f32.mrb[12].mxu1 }
 0x1d5   : > { %v3482_v40 = vmul.f32 0.11111111, %v1174_v37  ;;  %v1594_v41 = vpop.f32.mrb[20].mxu0  ;;  %v3025_v42 = vpop.f32.mrb[13].mxu1  ;;  %v2007_v37 = vrot.slane %v3191_v24, %v3419_v44 }
 0x1d6   : > { %v3055_v43 = vpop.f32.mrb[21].mxu0  ;;  %v1820_v46 = vmul.f32 0.11111111, %v1594_v41 }
 0x1d7   : > { %v1826_v45 = vmul.f32 %v3482_v40, %v3478_v35 }
 0x1d8   : > { %v1244_v47 = vpop.f32.mrb[14].mxu1  ;;  %v1836_v61 = vsub.f32 %v1820_v46, %v1832_v52  ;;  %v2023_v46 = vrot.slane %v3192_v27, %v3419_v44  ;;  %v1835_v52 = vmul.f32 %v3496_v11, %v3496_v11  ;;  %v3179_v27 = vld [vmem:[%s3306_s29 + $0x64] ss:$16 sps:$4 sm:$0xff]  }
 0x1d9   : > { %v1830_v49 = vsub.f32 %v1818_v39, %v1826_v45  ;;  %v1734_v50 = vpop.f32.mrb[22].mxu0  ;;  %v3030_v51 = vpop.f32.mrb[15].mxu1  ;;  %v3492_v1 = vmul.f32 0.11111111, %v1244_v47  ;;  %v2039_v47 = vrot.slane %v3193_v29, %v3419_v44 }
 0x1da   : > { %v1822_v54 = vmul.f32 0.11111111, %v1734_v50  ;;  %v3065_v56 = vpop.f32.mrb[23].mxu0  ;;  %v1833_v50 = vmul.f32 %v3494_v10, %v3494_v10 }
 0x1db   : > { %v1856_v59 = vcombine.low %v1828_v48, %v1830_v49  ;;  %v1857_v60 = vcombine.high %v1828_v48, %v1830_v49  ;;  %v1827_v20 = vmul.f32 %v3492_v1, %v3496_v11 }
 0x1dc   : > { %v1838_v62 = vsub.f32 %v1822_v54, %v1834_v55  ;;  %v1384_v63 = vpop.f32.mrb[16].mxu1  ;;  %v2071_v54 = vrot.slane %v2057_v33, %v3428_v53  ;;  %v2103_v55 = vrot.slane %v2089_v36, %v3428_v53 }
 0x1dd   : > { %v3040_v5 = vpop.f32.mrb[17].mxu1  ;;  %v1817_v12 = vmul.f32 0.11111111, %v1384_v63  ;;  %v1864_v38 = vrot.slane %v1856_v59, %v3419_v44  ;;  %v1871_v39 = vrot.slane %v1857_v60, %v3419_v44  ;;  %v2072_v60 = vcombine.low %v2007_v37, %v2023_v46 }
 0x1de   : > { %v1888_v6 = vcombine.low %v1836_v61, %v1838_v62  ;;  %v1889_v9 = vcombine.high %v1836_v61, %v1838_v62  ;;  %v2104_v61 = vcombine.low %v2039_v47, %v2055_v2  ;;  %v2073_v62 = vcombine.high %v2007_v37, %v2023_v46 }
 0x1df   : > { %v1829_v25 = vsub.f32 %v1817_v12, %v1825_v17  ;;  %v3173_v12 = vld [vmem:[%s3306_s29 + $0x44] ss:$16 sps:$4 sm:$0xff]   ;;  %v2121_v17 = vcombine.high %v3467_v13, %v3470_v14  ;;  %v2080_v29 = vrot.slane %v2072_v60, %v3428_v53 }
 0x1e0   : > { %v1524_v16 = vpop.f32.mrb[18].mxu1  ;;  %v2112_v18 = vrot.slane %v2104_v61, %v3428_v53 }
 0x1e1   : > { %v1819_v21 = vmul.f32 0.11111111, %v1524_v16  ;;  %v3050_v22 = vpop.f32.mrb[19].mxu1  ;;  %v2123_v16 = vcombine.high %v2071_v54, %v2103_v55 }
 0x1e2   : > { %v1903_v22 = vrot.slane %v1889_v9, %v3419_v44 }
 0x1e3   : > { %v1831_v26 = vsub.f32 %v1819_v21, %v1827_v20  ;;  %v2105_v20 = vcombine.high %v2039_v47, %v2055_v2  ;;  %v1896_v21 = vrot.slane %v1888_v6, %v3419_v44  ;;  %v2175_v2 = vrot.slane %v3179_v27, %v3419_v44 }
 0x1e4   : > { %v1664_v28 = vpop.f32.mrb[20].mxu1 }
 0x1e5   : > { %v1872_v31 = vcombine.low %v1829_v25, %v1831_v26  ;;  %v1873_v23 = vcombine.high %v1829_v25, %v1831_v26  ;;  %v3060_v32 = vpop.f32.mrb[21].mxu1  ;;  %v1821_v43 = vmul.f32 0.11111111, %v1664_v28  ;;  %v3176_v26 = vld [vmem:[%s3306_s29 + $0x4c] ss:$16 sps:$4 sm:$0xff]   ;;  %v2119_v60 = vrot.slane %v2105_v20, %v3428_v53 }
 0x1e6   : > { %v3182_v28 = vld [vmem:[%s3306_s29 + $0x6c] ss:$16 sps:$4 sm:$0xff]   ;;  %v2159_v47 = vrot.slane %v3176_v26, %v3419_v44  ;;  %s3210_s29 = smov 32  }
 0x1e7   : > { %v1880_v41 = vrot.slane %v1872_v31, %v3419_v44  ;;  %v1887_v42 = vrot.slane %v1873_v23, %v3419_v44  ;;  %v1837_v56 = vsub.f32 %v1821_v43, %v1833_v50  ;;  %v2122_v31 = vcombine.low %v2071_v54, %v2103_v55 }
 0x1e8   : > { %v1804_v45 = vpop.f32.mrb[22].mxu1  ;;  %v2087_v23 = vrot.slane %v2073_v62, %v3428_v53 }
 0x1e9   : > { %v1920_v3 = vcombine.low %v1864_v38, %v1880_v41  ;;  %v1921_v4 = vcombine.high %v1864_v38, %v1880_v41  ;;  %v1936_v7 = vcombine.low %v1871_v39, %v1887_v42  ;;  %v1937_v48 = vcombine.high %v1871_v39, %v1887_v42  ;;  %v3070_v49 = vpop.f32.mrb[23].mxu1 }
 0x1ea   : > { %v1823_v51 = vmul.f32 0.11111111, %v1804_v45  ;;  %v2143_v39 = vrot.slane %v3173_v12, %v3419_v44  ;;  %v2126_v12 = vcombine.low %v2087_v23, %v2119_v60  ;;  %v2127_v26 = vcombine.high %v2087_v23, %v2119_v60 }
 0x1eb   : > { %v1935_v9 = vrot.slane %v1921_v4, %v3428_v53  ;;  %v3539_v37 = vrot.slane %v1920_v3, %v3428_v53  ;;  %v1944_v38 = vrot.slane %v1936_v7, %v3428_v53  ;;  %v1951_v46 = vrot.slane %v1937_v48, %v3428_v53 }
 0x1ec   : > { %v1839_v59 = vsub.f32 %v1823_v51, %v1835_v52  ;;  %v2191_v3 = vrot.slane %v3182_v28, %v3419_v44  ;;  %v2208_v61 = vcombine.low %v2143_v39, %v2159_v47 }
 0x1ee   : > { %v1904_v63 = vcombine.low %v1837_v56, %v1839_v59  ;;  %v1905_v5 = vcombine.high %v1837_v56, %v1839_v59  ;;  %v2124_v59 = vcombine.low %v2080_v29, %v2112_v18  ;;  %v2240_v62 = vcombine.low %v2175_v2, %v2191_v3 }
 0x1ef   : > { %v2241_v20 = vcombine.high %v2175_v2, %v2191_v3 }
 0x1f0   : > { %v1912_v24 = vrot.slane %v1904_v63, %v3419_v44  ;;  %v1919_v25 = vrot.slane %v1905_v5, %v3419_v44 }
 0x1f2   : > { %v1952_v32 = vcombine.low %v1896_v21, %v1912_v24  ;;  %v1953_v33 = vcombine.high %v1896_v21, %v1912_v24  ;;  %v1968_v36 = vcombine.low %v1903_v22, %v1919_v25  ;;  %v1969_v6 = vcombine.high %v1903_v22, %v1919_v25 }
 0x1f3   : > { %v2125_v21 = vcombine.high %v2080_v29, %v2112_v18  ;;  %v2216_v22 = vrot.slane %v2208_v61, %v3428_v53  ;;  %v2255_v29 = vrot.slane %v2241_v20, %v3428_v53  ;;  %v2375_v18 = vld [vmem:[%s3669_s6] sm:$0xff] }
 0x1f4   : > { %v1967_v41 = vrot.slane %v1953_v33, %v3428_v53  ;;  %v3545_v42 = vrot.slane %v1952_v32, %v3428_v53  ;;  %v1976_v43 = vrot.slane %v1968_v36, %v3428_v53  ;;  %v1983_v45 = vrot.slane %v1969_v6, %v3428_v53  ;;  %3077 = vmatprep.mubr.msk.f32.mxu0 %vm2355_vm2, %v2375_v18  ;;  %v2377_v6 = vld [vmem:[%s3670_s7] sm:$0xff] }
 0x1f5   : > { %v3213_v32 = vmov 0  }
 0x1f6   : > { %v1987_v4 = vcombine.high %v1935_v9, %v1967_v41  ;;  %v1985_v7 = vcombine.high %v3539_v37, %v3545_v42  ;;  %v1984_v49 = vcombine.low %v3539_v37, %v3545_v42  ;;  %v1988_v50 = vcombine.low %v1944_v38, %v1976_v43  ;;  %3170 = vset.pattern.permute.xlu1 %v3213_v32 }
 0x1f7   : > { %v1986_v51 = vcombine.low %v1935_v9, %v1967_v41  ;;  %v1990_v52 = vcombine.low %v1951_v46, %v1983_v45  ;;  %v1989_v54 = vcombine.high %v1944_v38, %v1976_v43  ;;  %v1991_v55 = vcombine.high %v1951_v46, %v1983_v45  ;;  %3169 = vset.pattern.permute.xlu0 %v3213_v32  ;;  %v2378_v9 = vld [vmem:[%s3670_s7 + $0x8] sm:$0xff]  ;;  %v2570_v41 = vld [vmem:[%s3674_s11] sm:$0xf]  ;;  %v2272_v43 = vpop.permute.xlu0 %2271  ;;  %v2296_v45 = vpop.permute.xlu1 %2295 }
 0x1f8   : > { %v3144_v56 = vpack.i.bf16 %v2123_v16, %v1987_v4  ;;  %v3134_v48 = vpack.i.bf16 %v2121_v17, %v1985_v7  ;;  %v3149_v63 = vpack.i.bf16 %v2124_v59, %v1988_v50  ;;  %v2248_v16 = vrot.slane %v2240_v62, %v3428_v53  ;;  %v2475_v38 = vld [vmem:[%s3672_s9 + $0x8] sm:$0xff] }
 0x1f9   : > { %v3139_v5 = vpack.i.bf16 %v2122_v31, %v1986_v51  ;;  %v2209_v17 = vcombine.high %v2143_v39, %v2159_v47  ;;  %v3159_v24 = vpack.i.bf16 %v2126_v12, %v1990_v52  ;;  %v3154_v25 = vpack.i.bf16 %v2125_v21, %v1989_v54  ;;  %v2474_v39 = vld [vmem:[%s3672_s9] sm:$0xff] }
 0x1fa   : > { %3145 = vrot.lane.b32.xlu1 %v3144_v56, %s3208_s27  ;;  %3135 = vrot.lane.b32.xlu0 %v3134_v48, %s3207_s26  ;;  %v2260_v27 = vcombine.low %v2216_v22, %v2248_v16  ;;  %v3164_v31 = vpack.i.bf16 %v2127_v26, %v1991_v55  ;;  %v2261_v23 = vcombine.high %v2216_v22, %v2248_v16  ;;  %s3221_s26 = smov 88   ;;  %s3222_s27 = smov 72  }
 0x1fb   : > { %v2223_v28 = vrot.slane %v2209_v17, %v3428_v53  ;;  %v2284_v46 = vpop.permute.xlu0 %2283  ;;  %v2350_v14 = vsel %vm490_vm0, %v2256_v8, %v2272_v43 }
 0x1fc   : > { %v2354_v20 = vsel %vm2351_vm3, %v2350_v14, %v2284_v46 }
 0x1fd   : > { %v2262_v33 = vcombine.low %v2223_v28, %v2255_v29  ;;  %v2263_v36 = vcombine.high %v2223_v28, %v2255_v29 }
 0x1fe   : > { %3150 = vrot.lane.b32.xlu1 %v3149_v63, %s3210_s29  ;;  %3140 = vrot.lane.b32.xlu0 %v3139_v5, %s3209_s28  ;;  %s2903_s28 = sshll.u32 %s3677_s22, 6 }
 0x202   : > { %3160 = vrot.lane.b32.xlu1 %v3159_v24, %s3211_s30  ;;  %3155 = vrot.lane.b32.xlu0 %v3154_v25, %s3212_s13 }
 0x206   : > { %3165 = vrot.lane.b32.xlu1 %v3164_v31, %s3214_s16  ;;  %2307 = vrot.lane.b32.xlu0 %v2260_v27, %s3210_s29  ;;  %v2358_v27 = vsel %vm2355_vm2, %v2354_v20, %v2296_v45 }
 0x20a   : > { %2319 = vrot.lane.b32.xlu1 %v2261_v23, %s3212_s13  ;;  %2331 = vrot.lane.b32.xlu0 %v2262_v33, %s3211_s30  ;;  %s470_s13 = scalar_lea.vmem %s3675_s12, %s2903_s28 }
 0x20e   : > { %2343 = vrot.lane.b32.xlu1 %v2263_v36, %s3214_s16  ;;  %2381 = vperm.xlu0 %3169, %v2377_v6  }
 0x212   : > { %2386 = vperm.xlu1 %3170, %v2378_v9   ;;  %2483 = vperm.xlu0 %3169, %v2475_v38   ;;  %v2376_v38 = vld [vmem:[%s3669_s6 + $0x8] sm:$0xff] }
 0x216   : > { %2478 = vperm.xlu1 %3170, %v2474_v39   ;;  %v2472_v39 = vld [vmem:[%s3671_s8] sm:$0xff] }
 0x217   : > { %3084 = vmatprep.mubr.msk.f32.mxu1 %vm2351_vm3, %v2472_v39 }
 0x21a   : > { %2573 = vperm.xlu1 %3170, %v2570_v41  }
 0x26c   : > { %v3146_v47 = vpop.permute.xlu1 %3145  ;;  %v3136_v2 = vpop.permute.xlu0 %3135 }
 0x26d   : > { %v3138_v3 = vunpack.i.h.bf16 %v3136_v2  ;;  %v3137_v4 = vunpack.i.l.bf16 %v3136_v2  ;;  %v3148_v54 = vunpack.i.h.bf16 %v3146_v47  ;;  %v3147_v55 = vunpack.i.l.bf16 %v3146_v47 }
 0x26f   : > { %v2349_v56 = vsel %vm490_vm0, %v2120_v15, %v3138_v3  ;;  %v2348_v48 = vsel %vm490_vm0, %v1984_v49, %v3137_v4 }
 0x270   : > { %v3151_v7 = vpop.permute.xlu1 %3150  ;;  %v3141_v50 = vpop.permute.xlu0 %3140 }
 0x271   : > { %v3143_v51 = vunpack.i.h.bf16 %v3141_v50  ;;  %v3142_v52 = vunpack.i.l.bf16 %v3141_v50  ;;  %v3153_v61 = vunpack.i.h.bf16 %v3151_v7  ;;  %v3152_v62 = vunpack.i.l.bf16 %v3151_v7  ;;  %v2473_v50 = vld [vmem:[%s3671_s8 + $0x8] sm:$0xff] }
 0x273   : > { %v2352_v59 = vsel %vm2351_vm3, %v2348_v48, %v3142_v52  ;;  %v2353_v60 = vsel %vm2351_vm3, %v2349_v56, %v3143_v51  ;;  %v3215_v51 = vmov 0.0|0.0  }
 0x274   : > { %v3161_v63 = vpop.permute.xlu1 %3160  ;;  %v3156_v5 = vpop.permute.xlu0 %3155  ;;  %v2356_v12 = vsel %vm2355_vm2, %v2352_v59, %v3147_v55  ;;  %v2357_v13 = vsel %vm2355_vm2, %v2353_v60, %v3148_v54 }
 0x275   : > { %v3158_v15 = vunpack.i.h.bf16 %v3156_v5  ;;  %v3157_v37 = vunpack.i.l.bf16 %v3156_v5  ;;  %v3163_v42 = vunpack.i.h.bf16 %v3161_v63  ;;  %v3162_v49 = vunpack.i.l.bf16 %v3161_v63  ;;  %v2569_v63 = vld [vmem:[%s3673_s10] sm:$0xf] }
 0x276   : > { %v2360_v21 = vsel %vm2359_vm4, %v2356_v12, %v3152_v62  ;;  %v2361_v22 = vsel %vm2359_vm4, %v2357_v13, %v3153_v61 }
 0x277   : > { %v2364_v16 = vsel %vm2363_vm5, %v2360_v21, %v3157_v37  ;;  %v2365_v17 = vsel %vm2363_vm5, %v2361_v22, %v3158_v15 }
 0x278   : > { %v3166_v24 = vpop.permute.xlu1 %3165  ;;  %v2308_v25 = vpop.permute.xlu0 %2307  ;;  %v2368_v8 = vsel %vm2367_vm6, %v2364_v16, %v3162_v49  ;;  %v2369_v26 = vsel %vm2367_vm6, %v2365_v17, %v3163_v42 }
 0x279   : > { %v3168_v57 = vunpack.i.h.bf16 %v3166_v24  ;;  %v3167_v58 = vunpack.i.l.bf16 %v3166_v24  ;;  %v2362_v18 = vsel %vm2359_vm4, %v2358_v27, %v2308_v25 }
 0x27b   : > { %v2372_v28 = vsel %vm2371_vm7, %v2368_v8, %v3167_v58  ;;  %v2373_v29 = vsel %vm2371_vm7, %v2369_v26, %v3168_v57 }
 0x27c   : > { %v2320_v31 = vpop.permute.xlu1 %2319  ;;  %v3094_v32 = vpack.c.bf16 %v2373_v29, %v2372_v28  ;;  %v2332_v33 = vpop.permute.xlu0 %2331 }
 0x27d   : > { %v2366_v23 = vsel %vm2363_vm5, %v2362_v18, %v2320_v31 }
 0x27e   : > { %3095 = vmatprep.subr.bf16.mxu0 %v3094_v32  ;;  %v2370_v36 = vsel %vm2367_vm6, %v2366_v23, %v2332_v33 }
 0x27f   : > { %3097 = vmatpush3.bf16.msra.mxu0 %v3094_v32 }
 0x280   : > { %v2344_v6 = vpop.permute.xlu1 %2343 }
 0x281   : > { %v2374_v9 = vsel %vm2371_vm7, %v2370_v36, %v2344_v6 }
 0x282   : > { %3075 = vmatprep.subr.mxu0 %v2374_v9 }
 0x283   : > { %3076 = vmatpush3.msra.mxu0 %v2374_v9 }
 0x284   : > { %3078 = vmatmul.mubr.msk.f32.vlgmr.msra.gmra.mrb[24].mxu0 %vm2355_vm2, %v2376_v38 }
 0x28d   : > { %v2382_v46 = vpop.permute.xlu0 %2381 }
 0x291   : > { %v2387_v43 = vpop.permute.xlu1 %2386  ;;  %v2484_v52 = vpop.permute.xlu0 %2483 }
 0x295   : > { %v2479_v55 = vpop.permute.xlu1 %2478 }
 0x299   : > { %v2574_v5 = vpop.permute.xlu1 %2573 }
 0x357   : > { %v3079_v41 = vpop.f32.mrb[24].mxu0 }
 0x358   : > { %v2467_v45 = vadd.f32 %v3079_v41, %v2387_v43  ;;  %v2461_v47 = vpop.f32.mrb[25].mxu0 }
 0x359   : > { %v2462_v2 = vadd.f32 %v2461_v47, %v2382_v46 }
 0x35a   : > { %v2471_v3 = vmax.f32 %v2467_v45, 0.0 }
 0x35b   : > { %v2470_v4 = vmax.f32 %v2462_v2, 0.0 }
 0x35d   : > { %v3098_v7 = vpack.c.bf16 %v2471_v3, %v2470_v4 }
 0x35f   : > { %3099 = vmatprep.subr.bf16.mxu1 %v3098_v7 }
 0x360   : > { %3101 = vmatpush3.bf16.msra.mxu1 %v3098_v7 }
 0x361   : > { %3102 = vmatprep.subr.bf16.mxu1 %v3215_v51 }
 0x363   : > { %3085 = vmatmul.mubr.msk.f32.vlgmr.msra.gmra.mrb[24].mxu1 %vm2351_vm3, %v2473_v50 }
 0x364   : > { %3091 = vmatprep.mubr.msk.f32.mxu1 %vm3204_vm1, %v3203_v19 }
 0x436   : > { %v3086_v54 = vpop.f32.mrb[24].mxu1 }
 0x437   : > { %v2564_v56 = vadd.f32 %v3086_v54, %v2484_v52  ;;  %v2558_v48 = vpop.f32.mrb[25].mxu1 }
 0x438   : > { %v2559_v59 = vadd.f32 %v2558_v48, %v2479_v55 }
 0x439   : > { %v2568_v60 = vmax.f32 %v2564_v56, 0.0 }
 0x43a   : > { %v2567_v61 = vmax.f32 %v2559_v59, 0.0 }
 0x43c   : > { %v3103_v62 = vpack.c.bf16 %v2568_v60, %v2567_v61 }
 0x43e   : > { %3104 = vmatpush3.bf16.msra.mxu1 %v3103_v62 }
 0x441   : > { %3092 = vmatmul.mubr.msk.f32.vlgmr.msra.gmra.mrb[26].mxu1 %vm2351_vm3, %v2569_v63 }
 0x514   : > { %v2645_v19 = vpop.f32.mrb[26].mxu1 }
 0x515   : > { %v2646_v12 = vadd.f32 %v2645_v19, %v2574_v5  ;;  %v3093_v13 = vpop.f32.mrb[27].mxu1 }
 0x517   : > { %2653 = vrot.lane.b32.xlu1 %v2646_v12, %s3216_s19  ;;  %2650 = vrot.lane.b32.xlu0 %v2646_v12, %s3217_s20 }
 0x51b   : > { %2659 = vrot.lane.b32.xlu1 %v2646_v12, %s3218_s23  ;;  %2656 = vrot.lane.b32.xlu0 %v2646_v12, %s3219_s24 }
 0x51f   : > { %2665 = vrot.lane.b32.xlu1 %v2646_v12, %s3220_s25  ;;  %2662 = vrot.lane.b32.xlu0 %v2646_v12, %s3221_s26 }
 0x523   : > { %2668 = vrot.lane.b32.xlu0 %v2646_v12, %s3222_s27 }
 0x589   : > { %v2654_v14 = vpop.permute.xlu1 %2653  ;;  %v2651_v15 = vpop.permute.xlu0 %2650 }
 0x58a   : > { %v2671_v16 = vcombine.low %v2646_v12, %v2654_v14 }
 0x58c   : > { %v2678_v25 = vrot.slane %v2671_v16, %v3419_v44 }
 0x58d   : > { %v2660_v37 = vpop.permute.xlu1 %2659  ;;  %v2657_v42 = vpop.permute.xlu0 %2656 }
 0x58e   : > { %v2679_v49 = vcombine.low %v2651_v15, %v2657_v42 }
 0x590   : > { %v2686_v17 = vrot.slane %v2679_v49, %v3419_v44 }
 0x591   : > { %v2666_v21 = vpop.permute.xlu1 %2665  ;;  %v2663_v22 = vpop.permute.xlu0 %2662 }
 0x592   : > { %v2687_v20 = vcombine.low %v2660_v37, %v2666_v21  ;;  %v2703_v58 = vcombine.low %v2678_v25, %v2686_v17  ;;  %v2704_v8 = vcombine.high %v2678_v25, %v2686_v17 }
 0x594   : > { %v2694_v26 = vrot.slane %v2687_v20, %v3419_v44  ;;  %v2711_v18 = vrot.slane %v2703_v58, %v3428_v53  ;;  %v2718_v31 = vrot.slane %v2704_v8, %v3428_v53 }
 0x595   : > { %v2669_v24 = vpop.permute.xlu0 %2668 }
 0x596   : > { %v2695_v57 = vcombine.low %v2663_v22, %v2669_v24 }
 0x598   : > { %v2702_v27 = vrot.slane %v2695_v57, %v3419_v44 }
 0x59a   : > { %v2719_v28 = vcombine.low %v2694_v26, %v2702_v27  ;;  %v2720_v29 = vcombine.high %v2694_v26, %v2702_v27 }
 0x59c   : > { %v2727_v32 = vrot.slane %v2719_v28, %v3428_v53  ;;  %v2734_v23 = vrot.slane %v2720_v29, %v3428_v53 }
 0x59e   : > { %v2735_v33 = vcombine.low %v2711_v18, %v2727_v32  ;;  %v2736_v36 = vcombine.high %v2711_v18, %v2727_v32  ;;  %v2737_v6 = vcombine.low %v2718_v31, %v2734_v23  ;;  %v2738_v9 = vcombine.high %v2718_v31, %v2734_v23 }
 0x5a0   : > { %v2739_v44 = vmul.f32 %v2735_v33, %v3476_v34  ;;  %v2740_v38 = vmul.f32 %v2736_v36, %v3494_v10  ;;  %v2741_v39 = vmul.f32 %v2737_v6, %v3478_v35  ;;  %v2742_v41 = vmul.f32 %v2738_v9, %v3496_v11  ;;  %2747 = vst.msk [vmem:[%s470_s13] sm:$0xff] %vm490_vm0, %v2735_v33 }
 0x5a1   : > { %2748 = vst.msk [vmem:[%s470_s13 + $0x8] sm:$0xff] %vm490_vm0, %v2736_v36  ;;  %2749 = vst.msk [vmem:[%s470_s13 + $0x10] sm:$0xff] %vm490_vm0, %v2737_v6 }
 0x5a2   : > { %2750 = vst.msk [vmem:[%s470_s13 + $0x18] sm:$0xff] %vm490_vm0, %v2738_v9  ;;  %v2743_v53 = vsub.f32 %v3474_v30, %v2739_v44  ;;  %v2744_v43 = vsub.f32 %v3490_v0, %v2740_v38  ;;  %v2745_v34 = vsub.f32 %v3482_v40, %v2741_v39  ;;  %v2746_v10 = vsub.f32 %v3492_v1, %v2742_v41 }
 0x5a4   : > { %2896 = vst.msk [vmem:[%s470_s13 + $0x20] sm:$0xff] %vm490_vm0, %v2743_v53  ;;  %2897 = vst.msk [vmem:[%s470_s13 + $0x28] sm:$0xff] %vm490_vm0, %v2744_v43 }
 0x5a5   : > { %2898 = vst.msk [vmem:[%s470_s13 + $0x30] sm:$0xff] %vm490_vm0, %v2745_v34  ;;  %2899 = vst.msk [vmem:[%s470_s13 + $0x38] sm:$0xff] %vm490_vm0, %v2746_v10 }
 0x5a6 PF: > { %s22_s21 = sadd.s32 1, %s3201_s21  }
 0x5a7   : > { %p19_p4 = scmp.ge.s32.totalorder %s22_s21, 4  }
 0x5a9   :  { %21 = sbr.rel (!%p19_p4) target bundleno = 1 (0x1), region = 108 }

</bundles_post_ra>
